<compile_context>
chip_gen: v7x
topology: tpu7x:2x2x1
jax: 0.10.0
libtpu: 0.0.40
codegen_flags: <defaults>
</compile_context>

<pallas_src>
import jax
import jax.numpy as jnp
import numpy as np
from jax.experimental import pallas as pl
from jax.experimental.pallas import tpu as pltpu


def _epilogue(acc, evec_ref, eval_ref, x_ref, w3_ref, bpost_ref, wx_ref, bx_ref,
              out_ref):
    """Per-row-tile epilogue: GCN recombine -> masked 3->P affine -> ReLU -> linear_x -> concat."""
    F = eval_ref.shape[1]
    AV = acc[:, 0:F]                 # A @ Vz
    AV2 = acc[:, F:2 * F]            # A @ Vz^2
    n_nan = acc[:, 2 * F:3 * F]      # #NaN in-neighbors per (node, freq)
    deg = acc[:, 3 * F:3 * F + 1]    # in-degree

    V = evec_ref[...]                # f32 row-tile eigvecs (elementwise math in f32)
    Lam = eval_ref[...]
    vec_nan = jnp.isnan(V)
    Vz = jnp.where(vec_nan, 0.0, V)

    has_edges = deg > 0.5
    # True value is a sum of squares >= 0; clamp guards bf16 cancellation.
    num = jnp.maximum(deg * (Vz * Vz) - 2.0 * Vz * AV + AV2, 0.0)
    gcn = jnp.where(has_edges, num / jnp.where(has_edges, deg, 1.0), 0.0)

    # NaN pattern of the scatter-mean output (== empty_mask[:, :, 0]) and of EigVals.
    mask0 = has_edges & (vec_nan | (n_nan > 0.5))
    mask1 = jnp.isnan(Lam)

    p0 = jnp.where(mask0, 0.0, gcn)
    p1 = jnp.where(mask0 | mask1, 0.0, Lam)
    valid = jnp.where(mask0, 0.0, 1.0)

    # linear_A + masked_fill_(empty_mask[:,:,0]) + freq-sum + post_mlp Linear (folded):
    #   pe = (Σ_f p0)·w0 + (Σ_f p1·~m0)·w1 + (Σ_f ~m0)·w2 + bpost ; ReLU
    s0 = jnp.sum(p0, axis=1, keepdims=True)
    s1 = jnp.sum(p1, axis=1, keepdims=True)
    s2 = jnp.sum(valid, axis=1, keepdims=True)
    w3 = w3_ref[...]                                 # rows: wA[0]@wpost, wA[1]@wpost, bA@wpost
    pe = s0 * w3[0:1, :] + s1 * w3[1:2, :] + s2 * w3[2:3, :] + bpost_ref[...]
    pe = jnp.maximum(pe, 0.0)

    # expand_x: linear_x(batch.x)
    h = jnp.dot(x_ref[...], wx_ref[...],
                preferred_element_type=jnp.float32) + bx_ref[...]

    # batch.x = cat((h, pos_enc), 1) -- static slice stores, no concat intermediate.
    dx = h.shape[1]
    out_ref[:, :dx] = h
    out_ref[:, dx:] = pe


def stable_lappe_stripe_kernel(adj_ref, r_ref, evec_ref, eval_ref, x_ref,
                               w3_ref, bpost_ref, wx_ref, bx_ref, out_ref):
    # Full-row stripe: one MXU pass per row tile, no k-axis / accumulator.
    a = adj_ref[...].astype(jnp.bfloat16)            # int8 -> bf16 rides VPU slack
    acc = jnp.dot(a, r_ref[...], preferred_element_type=jnp.float32)
    _epilogue(acc, evec_ref, eval_ref, x_ref, w3_ref, bpost_ref, wx_ref, bx_ref,
              out_ref)


def stable_lappe_tiled_kernel(adj_ref, r_ref, evec_ref, eval_ref, x_ref,
                              w3_ref, bpost_ref, wx_ref, bx_ref, out_ref,
                              acc_ref):
    k = pl.program_id(1)

    @pl.when(k == 0)
    def _():
        acc_ref[...] = jnp.zeros_like(acc_ref)

    a = adj_ref[...].astype(jnp.bfloat16)            # int8 -> bf16 rides VPU slack
    acc_ref[...] += jnp.dot(a, r_ref[...], preferred_element_type=jnp.float32)

    @pl.when(k == pl.num_programs(1) - 1)
    def _():
        _epilogue(acc_ref[...], evec_ref, eval_ref, x_ref, w3_ref, bpost_ref,
                  wx_ref, bx_ref, out_ref)


def _round_up(x, m):
    return ((x + m - 1) // m) * m


def stable_lappe_forward(edge_index, eigvecs, eigvals3, x, params,
                         *, tile_m=256, tile_k=512,
                         stripe_vmem_budget=20 * 1024 * 1024):
    """Pad rows/cols independently, build int8 A + packed bf16 RHS, call the gridded kernel."""
    N, F = eigvecs.shape
    Din = x.shape[1]
    P = params["wpost"].shape[0]
    Dx = params["wx"].shape[1]
    dim_emb = Dx + P
    C = 3 * F + 1

    # Row tiling: multiple of 128; keep >=2 row tiles when possible (v7x megacore).
    n_rows_128 = _round_up(max(N, 1), 128)
    tile_m = min(tile_m, max(128, (n_rows_128 // 2) // 128 * 128))
    n_rows = _round_up(max(N, 1), tile_m)

    # Column padding independent of row padding.
    n_cols = _round_up(max(N, 1), 128)
    # Full-row stripe only if double-buffered A stripe + packed RHS + small inputs fit
    # the budget (kept ~20 MiB so the same choice stays safe on v7x's 64 MiB VMEM).
    stripe_bytes = (2 * tile_m * n_cols * 1           # A stripe, int8, double-buffered
                    + 2 * n_cols * C * 2               # packed RHS, bf16
                    + 4 * tile_m * (2 * F + Din + dim_emb) * 4)
    full_row = stripe_bytes <= stripe_vmem_budget
    if not full_row:
        n_cols = _round_up(max(N, 1), tile_k)

    def pad_to(a, n):
        return jnp.pad(a, ((0, n - a.shape[0]), (0, 0)))

    eigvals = eigvals3.reshape(N, F)
    V = eigvecs.astype(jnp.float32)
    Lam = eigvals.astype(jnp.float32)

    V_r = pad_to(V, n_rows)
    Lam_r = pad_to(Lam, n_rows)
    X_r = pad_to(x.astype(jnp.float32), n_rows)

    # Dense adjacency: adj[i, j] = #edges j -> i (PyG flow 'source_to_target').
    # Scattered DIRECTLY into int8: 1 B/elem in HBM, exact for multi-edge counts < 128.
    src, dst = edge_index[0], edge_index[1]
    adj = jnp.zeros((n_rows, n_cols), jnp.int8).at[dst, src].add(
        jnp.ones_like(src, dtype=jnp.int8))

    # Packed MXU RHS so ONE matmul yields AV, A(V^2), NaN-neighbor counts and degree.
    V_c = pad_to(V, n_cols)
    vec_nan_c = jnp.isnan(V_c)
    Vz_c = jnp.where(vec_nan_c, 0.0, V_c)
    R = jnp.concatenate(
        [Vz_c, Vz_c * Vz_c, vec_nan_c.astype(jnp.float32),
         jnp.ones((n_cols, 1), jnp.float32)], axis=1).astype(jnp.bfloat16)

    # post_mlp Linear folded into the 3->P affine (exact: linear before the ReLU).
    W3 = jnp.concatenate([params["wA"], params["bA"]], axis=0) @ params["wpost"]

    small_specs = [
        pl.BlockSpec((3, P), lambda *a: (0, 0)),       # [wA; bA] @ wpost
        pl.BlockSpec((1, P), lambda *a: (0, 0)),       # bpost
        pl.BlockSpec((Din, Dx), lambda *a: (0, 0)),    # wx
        pl.BlockSpec((1, Dx), lambda *a: (0, 0)),      # bx
    ]
    args = (adj, R, V_r, Lam_r, X_r, W3, params["bpost"], params["wx"], params["bx"])
    out_shape = jax.ShapeDtypeStruct((n_rows, dim_emb), jnp.float32)

    if full_row:
        grid_spec = pltpu.PrefetchScalarGridSpec(
            num_scalar_prefetch=0,
            grid=(n_rows // tile_m,),
            in_specs=[
                pl.BlockSpec((tile_m, n_cols), lambda i: (i, 0)),   # A row stripe (int8)
                pl.BlockSpec((n_cols, C), lambda i: (0, 0)),        # packed RHS (bf16)
                pl.BlockSpec((tile_m, F), lambda i: (i, 0)),        # EigVecs rows (f32)
                pl.BlockSpec((tile_m, F), lambda i: (i, 0)),        # EigVals rows
                pl.BlockSpec((tile_m, Din), lambda i: (i, 0)),      # x rows
            ] + small_specs,
            out_specs=pl.BlockSpec((tile_m, dim_emb), lambda i: (i, 0)),
            scratch_shapes=[],
        )
        kernel = stable_lappe_stripe_kernel
        dims = ("parallel",)
    else:
        grid_spec = pltpu.PrefetchScalarGridSpec(
            num_scalar_prefetch=0,
            grid=(n_rows // tile_m, n_cols // tile_k),
            in_specs=[
                pl.BlockSpec((tile_m, tile_k), lambda i, k: (i, k)),  # A tile (int8)
                pl.BlockSpec((tile_k, C), lambda i, k: (k, 0)),       # packed RHS (bf16)
                pl.BlockSpec((tile_m, F), lambda i, k: (i, 0)),       # EigVecs rows
                pl.BlockSpec((tile_m, F), lambda i, k: (i, 0)),       # EigVals rows
                pl.BlockSpec((tile_m, Din), lambda i, k: (i, 0)),     # x rows
            ] + small_specs,
            out_specs=pl.BlockSpec((tile_m, dim_emb), lambda i, k: (i, 0)),
            scratch_shapes=[pltpu.VMEM((tile_m, C), jnp.float32)],
        )
        kernel = stable_lappe_tiled_kernel
        dims = ("parallel", "arbitrary")

    out = pl.pallas_call(
        kernel,
        out_shape=out_shape,
        grid_spec=grid_spec,
        compiler_params=pltpu.CompilerParams(
            dimension_semantics=dims,
            vmem_limit_bytes=32 * 1024 * 1024,
        ),
    )(*args)
    return out[:N]


def reference_forward(edge_index, eigvecs, eigvals3, x, params):
    """Pure-JAX replica of the PyTorch forward (scatter-mean GCN), for checking."""
    N, F = eigvecs.shape
    eigvals = eigvals3.reshape(N, F)
    src, dst = edge_index[0], edge_index[1]
    msgs = (eigvecs[dst] - eigvecs[src]) ** 2                 # message()
    summed = jnp.zeros((N, F), jnp.float32).at[dst].add(msgs)
    cnt = jnp.zeros((N, 1), jnp.float32).at[dst, 0].add(1.0)
    gcn = jnp.where(cnt > 0, summed / jnp.where(cnt > 0, cnt, 1.0), 0.0)
    pos_enc = jnp.stack([gcn, eigvals], axis=2)               # [N, F, 2]
    mask = jnp.isnan(pos_enc)
    pos_enc = jnp.where(mask, 0.0, pos_enc)
    pe = jnp.einsum("nfc,cp->nfp", pos_enc, params["wA"]) + params["bA"][0]
    pe = jnp.where(mask[:, :, 0:1], 0.0, pe)
    pe = jnp.sum(pe, axis=1)
    pe = jnp.maximum(pe @ params["wpost"] + params["bpost"], 0.0)
    h = x @ params["wx"] + params["bx"]
    return jnp.concatenate([h, pe], axis=1)


if __name__ == "__main__":
    N, F, DIM_IN, DIM_PE, DIM_EMB = 300, 8, 4, 8, 16
    N_VALID_FREQS = 6   # remaining freq columns are NaN-padded, as in PyG LapPE

    key = jax.random.PRNGKey(0)
    k1, k2, k3, k4, k5, k6 = jax.random.split(key, 6)

    eigvecs = jax.random.normal(k1, (N, F), jnp.float32)
    eigvals = jnp.abs(jax.random.normal(k2, (N, F), jnp.float32))
    nan_cols = jnp.arange(F) >= N_VALID_FREQS
    eigvecs = jnp.where(nan_cols[None, :], jnp.nan, eigvecs)
    eigvals = jnp.where(nan_cols[None, :], jnp.nan, eigvals)
    eigvals3 = eigvals[:, :, None]          # batch.EigVals_st is [N, max_freqs, 1]
    x = jax.random.normal(k3, (N, DIM_IN), jnp.float32)

    # Bidirectional ring over nodes 0..N-2; node N-1 is isolated (degree 0).
    ring = np.arange(N - 1)
    src = np.concatenate([ring, (ring + 1) % (N - 1)])
    dst = np.concatenate([(ring + 1) % (N - 1), ring])
    edge_index = jnp.asarray(np.stack([src, dst]), jnp.int32)   # [2, 2*(N-1)]

    def linear_init(k, fan_in, fan_out):
        # deterministic nn.Linear-style init: U(-1/sqrt(fan_in), 1/sqrt(fan_in))
        kw, kb = jax.random.split(k)
        bound = 1.0 / float(np.sqrt(fan_in))
        w = jax.random.uniform(kw, (fan_in, fan_out), jnp.float32, -bound, bound)
        b = jax.random.uniform(kb, (1, fan_out), jnp.float32, -bound, bound)
        return w, b

    wA, bA = linear_init(k4, 2, DIM_PE)                 # linear_A: Linear(2, dim_pe)
    wpost, bpost = linear_init(k5, DIM_PE, DIM_PE)      # post_mlp: Linear(dim_pe, dim_pe)+ReLU
    wx, bx = linear_init(k6, DIM_IN, DIM_EMB - DIM_PE)  # linear_x: Linear(dim_in, dim_emb-dim_pe)
    params = dict(wA=wA, bA=bA, wpost=wpost, bpost=bpost, wx=wx, bx=bx)

    out = jax.block_until_ready(
        stable_lappe_forward(edge_index, eigvecs, eigvals3, x, params))
    ref = jax.block_until_ready(
        reference_forward(edge_index, eigvecs, eigvals3, x, params))

    assert out.shape == (N, DIM_EMB), out.shape
    assert not bool(np.any(np.isnan(np.asarray(out)))), "NaN leaked into output"
    np.testing.assert_allclose(np.asarray(out), np.asarray(ref), rtol=5e-2, atol=7.5e-2)
    print("KERNEL_OK")
</pallas_src>

<mosaic_0001>
module attributes {stable_mosaic.version = 11 : i64} {
  func.func @stable_lappe_stripe_kernel(%arg0: i32, %arg1: memref<128x384xi8, #tpu.memory_space<vmem>>, %arg2: memref<384x25xbf16, #tpu.memory_space<vmem>>, %arg3: memref<128x8xf32, #tpu.memory_space<vmem>>, %arg4: memref<128x8xf32, #tpu.memory_space<vmem>>, %arg5: memref<128x4xf32, #tpu.memory_space<vmem>>, %arg6: memref<3x8xf32, #tpu.memory_space<vmem>>, %arg7: memref<1x8xf32, #tpu.memory_space<vmem>>, %arg8: memref<4x8xf32, #tpu.memory_space<vmem>>, %arg9: memref<1x8xf32, #tpu.memory_space<vmem>>, %arg10: memref<128x16xf32, #tpu.memory_space<vmem>>) attributes {dimension_semantics = [#tpu.dimension_semantics<parallel>], iteration_bounds = array<i64: 3>, scalar_prefetch = 0 : i64, scratch_operands = 0 : i64, tpu.core_type = #tpu.core_type<tc>, window_params = [{transform_indices = @transform_0, window_bounds = array<i64: 128, 384>}, {pipeline_mode = #tpu.pipeline_mode<synchronous>, transform_indices = @transform_1, window_bounds = array<i64: 384, 25>}, {transform_indices = @transform_2, window_bounds = array<i64: 128, 8>}, {transform_indices = @transform_3, window_bounds = array<i64: 128, 8>}, {transform_indices = @transform_4, window_bounds = array<i64: 128, 4>}, {pipeline_mode = #tpu.pipeline_mode<synchronous>, transform_indices = @transform_5, window_bounds = array<i64: 3, 8>}, {pipeline_mode = #tpu.pipeline_mode<synchronous>, transform_indices = @transform_6, window_bounds = array<i64: 1, 8>}, {pipeline_mode = #tpu.pipeline_mode<synchronous>, transform_indices = @transform_7, window_bounds = array<i64: 4, 8>}, {pipeline_mode = #tpu.pipeline_mode<synchronous>, transform_indices = @transform_8, window_bounds = array<i64: 1, 8>}, {transform_indices = @transform_9, window_bounds = array<i64: 128, 16>}]} {
    %c0 = arith.constant 0 : index
    %c0_0 = arith.constant 0 : index
    %0 = vector.load %arg1[%c0, %c0_0] : memref<128x384xi8, #tpu.memory_space<vmem>>, vector<128x384xi8>
    %1 = arith.sitofp %0 : vector<128x384xi8> to vector<128x384xbf16>
    %c0_1 = arith.constant 0 : index
    %c0_2 = arith.constant 0 : index
    %2 = vector.load %arg2[%c0_1, %c0_2] : memref<384x25xbf16, #tpu.memory_space<vmem>>, vector<384x25xbf16>
    %cst = arith.constant dense<0.000000e+00> : vector<128x25xf32>
    %3 = tpu.matmul %1, %2, %cst {dimension_numbers = #tpu.dot_dimension_numbers<[1], [0], [0], [1], [0, 0, 1, 1], [], []>} : vector<128x384xbf16>, vector<384x25xbf16>, vector<128x25xf32> -> vector<128x25xf32>
    %4 = vector.extract_strided_slice %3 {offsets = [0, 0], sizes = [128, 8], strides = [1, 1]} : vector<128x25xf32> to vector<128x8xf32>
    %5 = vector.extract_strided_slice %3 {offsets = [0, 8], sizes = [128, 8], strides = [1, 1]} : vector<128x25xf32> to vector<128x8xf32>
    %6 = vector.extract_strided_slice %3 {offsets = [0, 16], sizes = [128, 8], strides = [1, 1]} : vector<128x25xf32> to vector<128x8xf32>
    %7 = vector.extract_strided_slice %3 {offsets = [0, 24], sizes = [128, 1], strides = [1, 1]} : vector<128x25xf32> to vector<128x1xf32>
    %c0_3 = arith.constant 0 : index
    %c0_4 = arith.constant 0 : index
    %8 = vector.load %arg3[%c0_3, %c0_4] : memref<128x8xf32, #tpu.memory_space<vmem>>, vector<128x8xf32>
    %c0_5 = arith.constant 0 : index
    %c0_6 = arith.constant 0 : index
    %9 = vector.load %arg4[%c0_5, %c0_6] : memref<128x8xf32, #tpu.memory_space<vmem>>, vector<128x8xf32>
    %10 = arith.cmpf one, %8, %8 : vector<128x8xf32>
    %cst_7 = arith.constant 0.000000e+00 : f32
    %11 = vector.broadcast %cst_7 : f32 to vector<128x8xf32>
    %12 = arith.select %10, %11, %8 : vector<128x8xi1>, vector<128x8xf32>
    %cst_8 = arith.constant 5.000000e-01 : f32
    %13 = vector.broadcast %cst_8 : f32 to vector<128x1xf32>
    %14 = arith.cmpf ogt, %7, %13 : vector<128x1xf32>
    %15 = arith.mulf %12, %12 : vector<128x8xf32>
    %16 = vector.broadcast %7 : vector<128x1xf32> to vector<128x8xf32>
    %17 = arith.mulf %16, %15 : vector<128x8xf32>
    %cst_9 = arith.constant 2.000000e+00 : f32
    %18 = vector.broadcast %cst_9 : f32 to vector<128x8xf32>
    %19 = arith.mulf %18, %12 : vector<128x8xf32>
    %20 = arith.mulf %19, %4 : vector<128x8xf32>
    %21 = arith.subf %17, %20 : vector<128x8xf32>
    %22 = arith.addf %21, %5 : vector<128x8xf32>
    %cst_10 = arith.constant 0.000000e+00 : f32
    %23 = vector.broadcast %cst_10 : f32 to vector<128x8xf32>
    %24 = arith.maximumf %22, %23 : vector<128x8xf32>
    %cst_11 = arith.constant 1.000000e+00 : f32
    %25 = vector.broadcast %cst_11 : f32 to vector<128x1xf32>
    %26 = arith.select %14, %7, %25 : vector<128x1xi1>, vector<128x1xf32>
    %27 = vector.broadcast %26 : vector<128x1xf32> to vector<128x8xf32>
    %28 = arith.divf %24, %27 : vector<128x8xf32>
    %cst_12 = arith.constant 0.000000e+00 : f32
    %29 = vector.shape_cast %14 : vector<128x1xi1> to vector<128x1xi1>
    %30 = vector.broadcast %29 : vector<128x1xi1> to vector<128x8xi1>
    %31 = vector.broadcast %cst_12 : f32 to vector<128x8xf32>
    %32 = arith.select %30, %28, %31 : vector<128x8xi1>, vector<128x8xf32>
    %cst_13 = arith.constant 5.000000e-01 : f32
    %33 = vector.broadcast %cst_13 : f32 to vector<128x8xf32>
    %34 = arith.cmpf ogt, %6, %33 : vector<128x8xf32>
    %35 = arith.ori %10, %34 : vector<128x8xi1>
    %36 = vector.broadcast %14 : vector<128x1xi1> to vector<128x8xi1>
    %37 = arith.andi %36, %35 : vector<128x8xi1>
    %38 = arith.cmpf one, %9, %9 : vector<128x8xf32>
    %cst_14 = arith.constant 0.000000e+00 : f32
    %39 = vector.broadcast %cst_14 : f32 to vector<128x8xf32>
    %40 = arith.select %37, %39, %32 : vector<128x8xi1>, vector<128x8xf32>
    %41 = arith.ori %37, %38 : vector<128x8xi1>
    %cst_15 = arith.constant 0.000000e+00 : f32
    %42 = vector.broadcast %cst_15 : f32 to vector<128x8xf32>
    %43 = arith.select %41, %42, %9 : vector<128x8xi1>, vector<128x8xf32>
    %cst_16 = arith.constant 0.000000e+00 : f32
    %cst_17 = arith.constant 1.000000e+00 : f32
    %44 = vector.broadcast %cst_16 : f32 to vector<128x8xf32>
    %45 = vector.broadcast %cst_17 : f32 to vector<128x8xf32>
    %46 = arith.select %37, %44, %45 : vector<128x8xi1>, vector<128x8xf32>
    %cst_18 = arith.constant dense<0.000000e+00> : vector<128xf32>
    %47 = vector.multi_reduction <add>, %40, %cst_18 [1] : vector<128x8xf32> to vector<128xf32>
    %48 = vector.shape_cast %47 : vector<128xf32> to vector<128x1xf32>
    %cst_19 = arith.constant dense<0.000000e+00> : vector<128xf32>
    %49 = vector.multi_reduction <add>, %43, %cst_19 [1] : vector<128x8xf32> to vector<128xf32>
    %50 = vector.shape_cast %49 : vector<128xf32> to vector<128x1xf32>
    %cst_20 = arith.constant dense<0.000000e+00> : vector<128xf32>
    %51 = vector.multi_reduction <add>, %46, %cst_20 [1] : vector<128x8xf32> to vector<128xf32>
    %52 = vector.shape_cast %51 : vector<128xf32> to vector<128x1xf32>
    %c0_21 = arith.constant 0 : index
    %c0_22 = arith.constant 0 : index
    %53 = vector.load %arg6[%c0_21, %c0_22] : memref<3x8xf32, #tpu.memory_space<vmem>>, vector<3x8xf32>
    %54 = vector.extract_strided_slice %53 {offsets = [0, 0], sizes = [1, 8], strides = [1, 1]} : vector<3x8xf32> to vector<1x8xf32>
    %55 = vector.broadcast %48 : vector<128x1xf32> to vector<128x8xf32>
    %56 = vector.broadcast %54 : vector<1x8xf32> to vector<128x8xf32>
    %57 = arith.mulf %55, %56 : vector<128x8xf32>
    %58 = vector.extract_strided_slice %53 {offsets = [1, 0], sizes = [1, 8], strides = [1, 1]} : vector<3x8xf32> to vector<1x8xf32>
    %59 = vector.broadcast %50 : vector<128x1xf32> to vector<128x8xf32>
    %60 = vector.broadcast %58 : vector<1x8xf32> to vector<128x8xf32>
    %61 = arith.mulf %59, %60 : vector<128x8xf32>
    %62 = arith.addf %57, %61 : vector<128x8xf32>
    %63 = vector.extract_strided_slice %53 {offsets = [2, 0], sizes = [1, 8], strides = [1, 1]} : vector<3x8xf32> to vector<1x8xf32>
    %64 = vector.broadcast %52 : vector<128x1xf32> to vector<128x8xf32>
    %65 = vector.broadcast %63 : vector<1x8xf32> to vector<128x8xf32>
    %66 = arith.mulf %64, %65 : vector<128x8xf32>
    %67 = arith.addf %62, %66 : vector<128x8xf32>
    %c0_23 = arith.constant 0 : index
    %c0_24 = arith.constant 0 : index
    %68 = vector.load %arg7[%c0_23, %c0_24] : memref<1x8xf32, #tpu.memory_space<vmem>>, vector<1x8xf32>
    %69 = vector.broadcast %68 : vector<1x8xf32> to vector<128x8xf32>
    %70 = arith.addf %67, %69 : vector<128x8xf32>
    %cst_25 = arith.constant 0.000000e+00 : f32
    %71 = vector.broadcast %cst_25 : f32 to vector<128x8xf32>
    %72 = arith.maximumf %70, %71 : vector<128x8xf32>
    %c0_26 = arith.constant 0 : index
    %c0_27 = arith.constant 0 : index
    %73 = vector.load %arg5[%c0_26, %c0_27] : memref<128x4xf32, #tpu.memory_space<vmem>>, vector<128x4xf32>
    %c0_28 = arith.constant 0 : index
    %c0_29 = arith.constant 0 : index
    %74 = vector.load %arg8[%c0_28, %c0_29] : memref<4x8xf32, #tpu.memory_space<vmem>>, vector<4x8xf32>
    %cst_30 = arith.constant dense<0.000000e+00> : vector<128x8xf32>
    %75 = tpu.matmul %73, %74, %cst_30 {dimension_numbers = #tpu.dot_dimension_numbers<[1], [0], [0], [1], [0, 0, 1, 1], [], []>} : vector<128x4xf32>, vector<4x8xf32>, vector<128x8xf32> -> vector<128x8xf32>
    %c0_31 = arith.constant 0 : index
    %c0_32 = arith.constant 0 : index
    %76 = vector.load %arg9[%c0_31, %c0_32] : memref<1x8xf32, #tpu.memory_space<vmem>>, vector<1x8xf32>
    %77 = vector.broadcast %76 : vector<1x8xf32> to vector<128x8xf32>
    %78 = arith.addf %75, %77 : vector<128x8xf32>
    %c0_33 = arith.constant 0 : index
    %c0_34 = arith.constant 0 : index
    %79 = vector.load %arg10[%c0_33, %c0_34] : memref<128x16xf32, #tpu.memory_space<vmem>>, vector<128x8xf32>
    tpu.vector_store %arg10[%c0_33, %c0_34], %78 {strides = array<i32>} : memref<128x16xf32, #tpu.memory_space<vmem>>, vector<128x8xf32>,
    %c0_35 = arith.constant 0 : index
    %c8 = arith.constant 8 : index
    %80 = vector.load %arg10[%c0_35, %c8] : memref<128x16xf32, #tpu.memory_space<vmem>>, vector<128x8xf32>
    tpu.vector_store %arg10[%c0_35, %c8], %72 {strides = array<i32>} : memref<128x16xf32, #tpu.memory_space<vmem>>, vector<128x8xf32>,
    return
  }
  func.func @transform_0(%arg0: i32) -> (i32, i32) {
    %c0_i32 = arith.constant 0 : i32
    %c0_i32_0 = arith.constant 0 : i32
    return %arg0, %c0_i32 : i32, i32
  }
  func.func @transform_1(%arg0: i32) -> (i32, i32) {
    %c0_i32 = arith.constant 0 : i32
    %c0_i32_0 = arith.constant 0 : i32
    %c0_i32_1 = arith.constant 0 : i32
    return %c0_i32, %c0_i32_0 : i32, i32
  }
  func.func @transform_2(%arg0: i32) -> (i32, i32) {
    %c0_i32 = arith.constant 0 : i32
    %c0_i32_0 = arith.constant 0 : i32
    return %arg0, %c0_i32 : i32, i32
  }
  func.func @transform_3(%arg0: i32) -> (i32, i32) {
    %c0_i32 = arith.constant 0 : i32
    %c0_i32_0 = arith.constant 0 : i32
    return %arg0, %c0_i32 : i32, i32
  }
  func.func @transform_4(%arg0: i32) -> (i32, i32) {
    %c0_i32 = arith.constant 0 : i32
    %c0_i32_0 = arith.constant 0 : i32
    return %arg0, %c0_i32 : i32, i32
  }
  func.func @transform_5(%arg0: i32) -> (i32, i32) {
    %c0_i32 = arith.constant 0 : i32
    %c0_i32_0 = arith.constant 0 : i32
    %c0_i32_1 = arith.constant 0 : i32
    return %c0_i32, %c0_i32_0 : i32, i32
  }
  func.func @transform_6(%arg0: i32) -> (i32, i32) {
    %c0_i32 = arith.constant 0 : i32
    %c0_i32_0 = arith.constant 0 : i32
    %c0_i32_1 = arith.constant 0 : i32
    return %c0_i32, %c0_i32_0 : i32, i32
  }
  func.func @transform_7(%arg0: i32) -> (i32, i32) {
    %c0_i32 = arith.constant 0 : i32
    %c0_i32_0 = arith.constant 0 : i32
    %c0_i32_1 = arith.constant 0 : i32
    return %c0_i32, %c0_i32_0 : i32, i32
  }
  func.func @transform_8(%arg0: i32) -> (i32, i32) {
    %c0_i32 = arith.constant 0 : i32
    %c0_i32_0 = arith.constant 0 : i32
    %c0_i32_1 = arith.constant 0 : i32
    return %c0_i32, %c0_i32_0 : i32, i32
  }
  func.func @transform_9(%arg0: i32) -> (i32, i32) {
    %c0_i32 = arith.constant 0 : i32
    %c0_i32_0 = arith.constant 0 : i32
    return %arg0, %c0_i32 : i32, i32
  }
}

</mosaic_0001>

<bundles_post_ra>
// kernel: tpu_custom_call.1
= control target key start
LH: loop header
LB: loop body
LE: loop exit
PB: predicated region body
PF: predicated region fallthrough
CT: control target
= control target key end

     0   :  { %s2572_s30 = smov 0   ;;  %s3871_s0 = inlined_call_operand.vmem [shape: s8[384,384], index: 0, kind: input, shape index: {}]   ;;  %s3872_s1 = inlined_call_operand.vmem [shape: bf16[384,25], index: 1, kind: input, shape index: {}]   ;;  %s3873_s2 = inlined_call_operand.vmem [shape: f32[384,8], index: 2, kind: input, shape index: {}]   ;;  %s3874_s3 = inlined_call_operand.vmem [shape: f32[384,8], index: 3, kind: input, shape index: {}]   ;;  %s3875_s4 = inlined_call_operand.vmem [shape: f32[384,4], index: 4, kind: input, shape index: {}]   ;;  %s3876_s5 = inlined_call_operand.vmem [shape: f32[3,8], index: 5, kind: input, shape index: {}]   ;;  %s3877_s6 = inlined_call_operand.vmem [shape: f32[1,8], index: 6, kind: input, shape index: {}]   ;;  %s3878_s7 = inlined_call_operand.vmem [shape: f32[4,8], index: 7, kind: input, shape index: {}]   ;;  %s3879_s8 = inlined_call_operand.vmem [shape: f32[1,8], index: 8, kind: input, shape index: {}]   ;;  %s3880_s9 = inlined_call_operand.vmem [shape: f32[384,16], index: 9, kind: output, shape index: {}]  }
   0x1 LB: > { %s2220_s10 = sadd.s32 4294967295, %s2514_s30   ;;  %p2224_p0 = scmp.ge.s32.totalorder %s2514_s30, 1  ;;  %s2514_s30 = sphi %s2572_s30, %s19_s30  }
   0x2   : > { %p322_p1 = scmp.lt.s32.totalorder %s2514_s30, 4 }
   0x4   : > { %p323_p2 = pnand %p2224_p0, %p322_p1 }
   0x5   : > { %v2452_v0 = vld [vmem:[%s3872_s1 + $0x40] sm:$0xff] (!%p323_p2)   ;;  %v2455_v3 = vld [vmem:[%s3872_s1 + $0x48] sm:$0xff] (!%p323_p2)   ;;  %v2458_v6 = vld [vmem:[%s3872_s1 + $0x50] sm:$0xff] (!%p323_p2)   ;;  %s2225_s25 = sshll.u32 (!%p323_p2), %s2220_s10, 2  ;;  %v2516_v60 = vmov (!%p323_p2), 24   ;;  %s2517_s27 = smov (!%p323_p2), 120  }
   0x6   : > { %326 = sbr.rel (%p323_p2) target bundleno = 827 (0x33b), region = 56  ;;  %v2453_v1 = vld [vmem:[%s3872_s1 + $0x80] sm:$0xff] (!%p323_p2)   ;;  %2280 = vmatprep.subr.bf16.mxu0 (!%p323_p2), %v2452_v0  ;;  %v2456_v4 = vld [vmem:[%s3872_s1 + $0x88] sm:$0xff] (!%p323_p2)   ;;  %v2459_v7 = vld [vmem:[%s3872_s1 + $0x90] sm:$0xff] (!%p323_p2)   ;;  %p375_p3 = scmp.lt.s32.totalorder (!%p323_p2), %s2225_s25, 11  ;;  %2450 = vset.pattern.permute.xlu0 (!%p323_p2), %v2516_v60  ;;  %vm1882_vm14 = vcmask (!%p323_p2), 1043456  }
   0x7   : > { %v2454_v2 = vld [vmem:[%s3872_s1] sm:$0xff] (!%p323_p2)   ;;  %2377 = vmatprep.subr.bf16.mxu1 (!%p323_p2), %v2453_v1  ;;  %v2457_v5 = vld [vmem:[%s3872_s1 + $0x8] sm:$0xff] (!%p323_p2)   ;;  %v2460_v8 = vld [vmem:[%s3872_s1 + $0x10] sm:$0xff] (!%p323_p2)   ;;  %2451 = vset.pattern.permute.xlu1 (!%p323_p2), %v2516_v60  ;;  %s2227_s29 = sshll.u32 (!%p323_p2), %s2220_s10, 4  ;;  %vm3881_vm15 = vcmask (!%p323_p2), 31744   ;;  %s2521_s10 = smov (!%p323_p2), 8  }
   0x8   : > { %2281 = vmatpush3.bf16.msra.mxu0 (!%p323_p2), %v2454_v2  ;;  %2378 = vmatpush3.bf16.msra.mxu1 (!%p323_p2), %v2453_v1  ;;  %v2461_v9 = vld [vmem:[%s3872_s1 + $0x58] sm:$0xff] (!%p323_p2)   ;;  %v2464_v12 = vld [vmem:[%s3872_s1 + $0x60] sm:$0xff] (!%p323_p2)   ;;  %v2467_v15 = vld [vmem:[%s3872_s1 + $0x68] sm:$0xff] (!%p323_p2)   ;;  %p382_p4 = scmp.lt.s32.totalorder (!%p323_p2), %s2227_s29, 47 }
   0x9   : > { %2282 = vmatprep.subr.bf16.mxu0 (!%p323_p2), %v2455_v3  ;;  %2379 = vmatprep.subr.bf16.mxu1 (!%p323_p2), %v2456_v4  ;;  %v2462_v10 = vld [vmem:[%s3872_s1 + $0x98] sm:$0xff] (!%p323_p2)   ;;  %v2465_v13 = vld [vmem:[%s3872_s1 + $0xa0] sm:$0xff] (!%p323_p2)   ;;  %v2468_v16 = vld [vmem:[%s3872_s1 + $0xa8] sm:$0xff] (!%p323_p2)  }
   0xa   : > { %v2463_v11 = vld [vmem:[%s3872_s1 + $0x18] sm:$0xff] (!%p323_p2)   ;;  %v2466_v14 = vld [vmem:[%s3872_s1 + $0x20] sm:$0xff] (!%p323_p2)   ;;  %v2469_v17 = vld [vmem:[%s3872_s1 + $0x28] sm:$0xff] (!%p323_p2)  }
   0xb   : > { %v2470_v18 = vld [vmem:[%s3872_s1 + $0x70] sm:$0xff] (!%p323_p2)   ;;  %v2473_v23 = vld [vmem:[%s3872_s1 + $0x78] sm:$0xff] (!%p323_p2)  }
   0xc   : > { %2283 = vmatpush3.bf16.msra.mxu0 (!%p323_p2), %v2457_v5  ;;  %2380 = vmatpush3.bf16.msra.mxu1 (!%p323_p2), %v2456_v4  ;;  %v2471_v19 = vld [vmem:[%s3872_s1 + $0xb0] sm:$0xff] (!%p323_p2)   ;;  %v2474_v24 = vld [vmem:[%s3872_s1 + $0xb8] sm:$0xff] (!%p323_p2)  }
   0xd   : > { %2284 = vmatprep.subr.bf16.mxu0 %v2458_v6  ;;  %2381 = vmatprep.subr.bf16.mxu1 %v2459_v7  ;;  %s3961_s25 = smov (!%p375_p3, %s2225_s25), 11  ;;  %v2472_v20 = vld [vmem:[%s3872_s1 + $0x30] sm:$0xff]   ;;  %v2475_v27 = vld [vmem:[%s3872_s1 + $0x38] sm:$0xff]   ;;  %s3963_s29 = smov (!%p382_p4, %s2227_s29), 47 }
   0xe   : > { %s2435_s28 = smul.u32 24, %s3961_s25  ;;  %s2862_s11 = sshll.u32 %s3963_s29, 3 }
   0xf   : > { %s2874_s15 = scalar_lea.vmem %s3875_s4, %s2862_s11  ;;  %s2977_s20 = scalar_lea.vmem %s3874_s3, %s2862_s11 }
  0x10   : > { %2285 = vmatpush3.bf16.msra.mxu0 %v2460_v8  ;;  %2382 = vmatpush3.bf16.msra.mxu1 %v2459_v7  ;;  %s2645_s25 = scalar_lea.vmem %s3871_s0, %s2435_s28  ;;  %s2519_s28 = smov 112  }
  0x11   : > { %2286 = vmatprep.subr.bf16.mxu0 %v2461_v9  ;;  %2383 = vmatprep.subr.bf16.mxu1 %v2462_v10  ;;  %v407_v21 = vld [vmem:[%s2645_s25 + $0x8] sm:$0xff]  ;;  %v408_v22 = vld [vmem:[%s2645_s25 + $0x10] sm:$0xff]  ;;  %v406_v28 = vld [vmem:[%s2645_s25] sm:$0xff] }
  0x12   : > { %v419_v25 = vunpack.c.l.s8.bf16 %v407_v21  ;;  %v420_v26 = vunpack.c.l.s8.bf16 %v408_v22  ;;  %v411_v29 = vld [vmem:[%s2645_s25 + $0x28] sm:$0xff]  ;;  %v423_v30 = vunpack.c.h.s8.bf16 %v408_v22  ;;  %v418_v31 = vunpack.c.l.s8.bf16 %v406_v28  ;;  %v410_v34 = vld [vmem:[%s2645_s25 + $0x20] sm:$0xff]  ;;  %v409_v40 = vld [vmem:[%s2645_s25 + $0x18] sm:$0xff] }
  0x13   : > { %v422_v32 = vunpack.c.h.s8.bf16 %v407_v21  ;;  %v426_v33 = vunpack.c.l.s8.bf16 %v411_v29  ;;  %v414_v35 = vld [vmem:[%s2645_s25 + $0x40] sm:$0xff]  ;;  %v421_v36 = vunpack.c.h.s8.bf16 %v406_v28  ;;  %v429_v37 = vunpack.c.h.s8.bf16 %v411_v29  ;;  %v417_v41 = vld [vmem:[%s2645_s25 + $0x58] sm:$0xff]  ;;  %v412_v50 = vld [vmem:[%s2645_s25 + $0x30] sm:$0xff] }
  0x14   : > { %2287 = vmatpush3.bf16.msra.mxu0 %v2463_v11  ;;  %2384 = vmatpush3.bf16.msra.mxu1 %v2462_v10  ;;  %v425_v38 = vunpack.c.l.s8.bf16 %v410_v34  ;;  %v432_v39 = vunpack.c.l.s8.bf16 %v414_v35  ;;  %v424_v42 = vunpack.c.l.s8.bf16 %v409_v40  ;;  %v435_v43 = vunpack.c.h.s8.bf16 %v414_v35  ;;  %v413_v46 = vld [vmem:[%s2645_s25 + $0x38] sm:$0xff]  ;;  %v416_v53 = vld [vmem:[%s2645_s25 + $0x50] sm:$0xff]  ;;  %v415_v56 = vld [vmem:[%s2645_s25 + $0x48] sm:$0xff]  ;;  %s2956_s25 = scalar_lea.vmem %s3873_s2, %s2862_s11 }
  0x15   : > { %2288 = vmatprep.subr.bf16.mxu0 %v2464_v12  ;;  %2385 = vmatprep.subr.bf16.mxu1 %v2465_v13  ;;  %v428_v44 = vunpack.c.h.s8.bf16 %v410_v34  ;;  %v438_v45 = vunpack.c.l.s8.bf16 %v417_v41  ;;  %v427_v47 = vunpack.c.h.s8.bf16 %v409_v40  ;;  %v441_v48 = vunpack.c.h.s8.bf16 %v417_v41 }
  0x16   : > { %666 = vmatprep.mubr.bf16.mxu0 %v419_v25  ;;  %2393 = vmatprep.mubr.bf16.mxu1 %v420_v26  ;;  %v431_v49 = vunpack.c.l.s8.bf16 %v413_v46  ;;  %v430_v51 = vunpack.c.l.s8.bf16 %v412_v50  ;;  %v434_v52 = vunpack.c.h.s8.bf16 %v413_v46  ;;  %v433_v54 = vunpack.c.h.s8.bf16 %v412_v50 }
  0x17   : > { %v437_v55 = vunpack.c.l.s8.bf16 %v416_v53  ;;  %v436_v57 = vunpack.c.l.s8.bf16 %v415_v56  ;;  %v440_v58 = vunpack.c.h.s8.bf16 %v416_v53  ;;  %v439_v59 = vunpack.c.h.s8.bf16 %v415_v56 }
  0x18   : > { %2289 = vmatpush3.bf16.msra.mxu0 %v2466_v14  ;;  %2386 = vmatpush3.bf16.msra.mxu1 %v2465_v13  ;;  %v2518_v22 = vmov 0  }
  0x19   : > { %2290 = vmatprep.subr.bf16.mxu0 %v2467_v15  ;;  %2387 = vmatprep.subr.bf16.mxu1 %v2468_v16 }
  0x1c   : > { %2291 = vmatpush3.bf16.msra.mxu0 %v2469_v17  ;;  %2388 = vmatpush3.bf16.msra.mxu1 %v2468_v16 }
  0x1d   : > { %2292 = vmatprep.subr.bf16.mxu0 %v2470_v18  ;;  %2389 = vmatprep.subr.bf16.mxu1 %v2471_v19 }
  0x20   : > { %2293 = vmatpush3.bf16.msra.mxu0 %v2472_v20  ;;  %2390 = vmatpush3.bf16.msra.mxu1 %v2471_v19 }
  0x21   : > { %2294 = vmatprep.subr.bf16.mxu0 %v2473_v23  ;;  %2391 = vmatprep.subr.bf16.mxu1 %v2474_v24 }
  0x24   : > { %2295 = vmatpush3.bf16.msra.mxu0 %v2475_v27  ;;  %2392 = vmatpush3.bf16.msra.mxu1 %v2474_v24 }
  0x27   : > { %667 = vmatmul.mubr.bf16.vlgmr.msra.gmra.mrb[0].mxu0 %v418_v31  ;;  %2394 = vmatmul.mubr.bf16.vlgmr.msra.gmra.mrb[0].mxu1 %v423_v30 }
  0x28   : > { %674 = vmatprep.mubr.bf16.mxu0 %v422_v32  ;;  %2397 = vmatprep.mubr.bf16.mxu1 %v426_v33 }
  0x2f   : > { %675 = vmatmul.mubr.bf16.gmra.mrb[4].mxu0 %v421_v36  ;;  %2398 = vmatmul.mubr.bf16.gmra.mrb[4].mxu1 %v429_v37 }
  0x30   : > { %682 = vmatprep.mubr.bf16.mxu0 %v425_v38  ;;  %2401 = vmatprep.mubr.bf16.mxu1 %v432_v39 }
  0x37   : > { %683 = vmatmul.mubr.bf16.gmra.mrb[8].mxu0 %v424_v42  ;;  %2402 = vmatmul.mubr.bf16.gmra.mrb[8].mxu1 %v435_v43 }
  0x38   : > { %690 = vmatprep.mubr.bf16.mxu0 %v428_v44  ;;  %2405 = vmatprep.mubr.bf16.mxu1 %v438_v45 }
  0x3f   : > { %691 = vmatmul.mubr.bf16.gmra.mrb[12].mxu0 %v427_v47  ;;  %2406 = vmatmul.mubr.bf16.gmra.mrb[12].mxu1 %v441_v48 }
  0x40   : > { %698 = vmatprep.mubr.bf16.mxu0 %v431_v49 }
  0x47   : > { %699 = vmatmul.mubr.bf16.gmra.mrb[16].mxu0 %v430_v51 }
  0x48   : > { %706 = vmatprep.mubr.bf16.mxu0 %v434_v52 }
  0x4f   : > { %707 = vmatmul.mubr.bf16.gmra.mrb[20].mxu0 %v433_v54 }
  0x50   : > { %714 = vmatprep.mubr.bf16.mxu0 %v437_v55 }
  0x57   : > { %715 = vmatmul.mubr.bf16.gmra.mrb[24].mxu0 %v436_v57 }
  0x58   : > { %722 = vmatprep.mubr.bf16.mxu0 %v440_v58 }
  0x5f   : > { %723 = vmatmul.mubr.bf16.gmra.mrb[28].mxu0 %v439_v59 }
  0xfa   : > { %v2296_v61 = vpop.f32.mrb[0].mxu0  ;;  %v2395_v62 = vpop.f32.mrb[0].mxu1 }
  0xfb   : > { %v2297_v63 = vpop.f32.mrb[1].mxu0  ;;  %v765_v0 = vpop.f32.mrb[1].mxu1 }
  0xfc   : > { %v2298_v1 = vadd.f32 %v2297_v63, %v2296_v61  ;;  %v2299_v2 = vpop.f32.mrb[2].mxu0  ;;  %v2396_v3 = vpop.f32.mrb[2].mxu1 }
  0xfd   : > { %v2300_v4 = vpop.f32.mrb[3].mxu0  ;;  %v768_v5 = vpop.f32.mrb[3].mxu1 }
  0xfe   : > { %v2671_v6 = vadd.f32 %v2298_v1, %v765_v0  ;;  %v2301_v7 = vadd.f32 %v2300_v4, %v2299_v2 }
 0x100   : > { %v2673_v8 = vadd.f32 %v2301_v7, %v768_v5  ;;  %926 = vperm.xlu0 %2450, %v2671_v6   ;;  %vm892_vm1 = vcmp.gt.f32.partialorder %v2671_v6, 0.5 }
 0x101   : > { %v1148_v26 = vsel %vm892_vm1, %v2671_v6, 1.0  ;;  %v1276_v36 = vsel %vm892_vm1, 1, %v2518_v22 }
 0x102   : > { %v2302_v9 = vpop.f32.mrb[4].mxu0  ;;  %1070 = vrot.lane.b32.xlu1 %v2673_v8, %s2517_s27  ;;  %vm893_vm0 = vcmp.gt.f32.partialorder %v2673_v8, 0.5  ;;  %v2399_v10 = vpop.f32.mrb[4].mxu1 }
 0x103   : > { %v2303_v11 = vpop.f32.mrb[5].mxu0  ;;  %v781_v12 = vpop.f32.mrb[5].mxu1  ;;  %v1149_v17 = vsel %vm893_vm0, %v2673_v8, 1.0  ;;  %v1277_v23 = vsel %vm893_vm0, 1, %v2518_v22 }
 0x104   : > { %v2304_v13 = vadd.f32 %v2303_v11, %v2302_v9  ;;  %v2305_v14 = vpop.f32.mrb[6].mxu0  ;;  %1068 = vrot.lane.b32.xlu0 %v2671_v6, %s2517_s27  ;;  %v2400_v15 = vpop.f32.mrb[6].mxu1 }
 0x105   : > { %v2306_v16 = vpop.f32.mrb[7].mxu0  ;;  %v784_v18 = vpop.f32.mrb[7].mxu1 }
 0x106   : > { %v2684_v19 = vadd.f32 %v2395_v62, %v2304_v13  ;;  %v2307_v20 = vadd.f32 %v2306_v16, %v2305_v14  ;;  %1171 = vperm.xlu1 %2451, %v1149_v17  }
 0x108   : > { %v2686_v21 = vadd.f32 %v2396_v3, %v2307_v20  ;;  %931 = vperm.xlu0 %2450, %v2673_v8   ;;  %vm894_vm2 = vcmp.gt.f32.partialorder %v2684_v19, 0.5 }
 0x109   : > { %v1150_v51 = vsel %vm894_vm2, %v2684_v19, 1.0  ;;  %v1278_v60 = vsel %vm894_vm2, 1, %v2518_v22 }
 0x10a   : > { %1296 = vperm.xlu1 %2451, %v1277_v23   ;;  %v2308_v24 = vpop.f32.mrb[8].mxu0  ;;  %v2693_v25 = vpop.f32.mrb[8].mxu1  ;;  %vm895_vm3 = vcmp.gt.f32.partialorder %v2686_v21, 0.5 }
 0x10b   : > { %v2309_v27 = vpop.f32.mrb[9].mxu0  ;;  %v797_v28 = vpop.f32.mrb[9].mxu1  ;;  %v1151_v56 = vsel %vm895_vm3, %v2686_v21, 1.0  ;;  %v1279_v62 = vsel %vm895_vm3, 1, %v2518_v22 }
 0x10c   : > { %1166 = vperm.xlu0 %2450, %v1148_v26   ;;  %v2310_v29 = vadd.f32 %v2309_v27, %v2308_v24  ;;  %v2311_v30 = vpop.f32.mrb[10].mxu0  ;;  %v2404_v31 = vpop.f32.mrb[10].mxu1 }
 0x10d   : > { %v2312_v32 = vpop.f32.mrb[11].mxu0  ;;  %v800_v33 = vpop.f32.mrb[11].mxu1 }
 0x10e   : > { %1374 = vrot.lane.b32.xlu1 %v1277_v23, %s2519_s28  ;;  %v2313_v34 = vadd.f32 %v2312_v32, %v2311_v30  ;;  %v2699_v35 = vadd.f32 %v2310_v29, %v781_v12 }
 0x110   : > { %1293 = vperm.xlu0 %2450, %v1276_v36   ;;  %v2704_v37 = vadd.f32 %v2313_v34, %v784_v18  ;;  %vm896_vm9 = vcmp.gt.f32.partialorder %v2699_v35, 0.5 }
 0x111   : > { %v1152_v23 = vsel %vm896_vm9, %v2699_v35, 1.0  ;;  %v1280_v27 = vsel %vm896_vm9, 1, %v2518_v22 }
 0x112   : > { %936 = vperm.xlu1 %2451, %v2684_v19   ;;  %v2314_v38 = vpop.f32.mrb[12].mxu0  ;;  %v2707_v39 = vpop.f32.mrb[12].mxu1  ;;  %vm897_vm10 = vcmp.gt.f32.partialorder %v2704_v37, 0.5 }
 0x113   : > { %v2315_v40 = vpop.f32.mrb[13].mxu0  ;;  %v2709_v41 = vpop.f32.mrb[13].mxu1 }
 0x114   : > { %1372 = vrot.lane.b32.xlu0 %v1276_v36, %s2519_s28  ;;  %v2316_v42 = vadd.f32 %v2315_v40, %v2314_v38  ;;  %v2317_v43 = vpop.f32.mrb[14].mxu0  ;;  %v2712_v44 = vpop.f32.mrb[14].mxu1 }
 0x115   : > { %v2318_v45 = vpop.f32.mrb[15].mxu0  ;;  %v816_v46 = vpop.f32.mrb[15].mxu1 }
 0x116   : > { %941 = vperm.xlu1 %2451, %v2686_v21   ;;  %v2715_v47 = vadd.f32 %v2399_v10, %v2316_v42  ;;  %v2319_v48 = vadd.f32 %v2318_v45, %v2317_v43  ;;  %v1825_v45 = vld [vmem:[%s3878_s7] sm:$0xf] }
 0x117   : > { %2409 = vmatprep.subr.msk.mxu1 %vm1882_vm14, %v1825_v45 }
 0x118   : > { %1072 = vrot.lane.b32.xlu0 %v2684_v19, %s2517_s27  ;;  %v2720_v49 = vadd.f32 %v2400_v15, %v2319_v48  ;;  %vm898_vm11 = vcmp.gt.f32.partialorder %v2715_v47, 0.5  ;;  %2410 = vmatpush3.msk.msra.mxu1 %vm1882_vm14, %v1825_v45 }
 0x119   : > { %v1154_v38 = vsel %vm898_vm11, %v2715_v47, 1.0  ;;  %v1282_v40 = vsel %vm898_vm11, 1, %v2518_v22 }
 0x11a   : > { %1074 = vrot.lane.b32.xlu1 %v2686_v21, %s2517_s27  ;;  %v2320_v50 = vpop.f32.mrb[16].mxu0  ;;  %vm899_vm4 = vcmp.gt.f32.partialorder %v2720_v49, 0.5 }
 0x11b   : > { %v2321_v52 = vpop.f32.mrb[17].mxu0  ;;  %v2732_v53 = vsel %vm899_vm4, 1, %v2518_v22 }
 0x11c   : > { %1176 = vperm.xlu0 %2450, %v1150_v51   ;;  %v2322_v54 = vadd.f32 %v2321_v52, %v2320_v50  ;;  %v2323_v55 = vpop.f32.mrb[18].mxu0  ;;  %v1809_v50 = vld [vmem:[%s2874_s15] sm:$0xff]  ;;  %v1810_v51 = vld [vmem:[%s2874_s15 + $0x8] sm:$0xff] }
 0x11d   : > { %v2324_v57 = vpop.f32.mrb[19].mxu0  ;;  %2411 = vmatprep.mubr.msk.f32.mxu1 %vm3881_vm15, %v1809_v50  ;;  %v2986_v50 = vld [vmem:[%s2977_s20 + $0x8] sm:$0xff] }
 0x11e   : > { %1181 = vperm.xlu1 %2451, %v1151_v56   ;;  %v2325_v58 = vadd.f32 %v2324_v57, %v2323_v55  ;;  %v2737_v59 = vadd.f32 %v2322_v54, %v797_v28  ;;  %2412 = vmatmul.mubr.msk.f32.vlgmr.msra.gmra.mrb[16].mxu1 %vm3881_vm15, %v1810_v51 }
 0x120   : > { %1299 = vperm.xlu0 %2450, %v1278_v60   ;;  %v2742_v61 = vadd.f32 %v2325_v58, %v800_v33  ;;  %vm900_vm5 = vcmp.gt.f32.partialorder %v2737_v59, 0.5 }
 0x121   : > { %v2751_v63 = vsel %vm900_vm5, 1, %v2518_v22 }
 0x122   : > { %1302 = vperm.xlu1 %2451, %v1279_v62   ;;  %v2326_v0 = vpop.f32.mrb[20].mxu0  ;;  %vm901_vm6 = vcmp.gt.f32.partialorder %v2742_v61, 0.5 }
 0x123   : > { %v2327_v1 = vpop.f32.mrb[21].mxu0  ;;  %v2757_v2 = vsel %vm901_vm6, 1, %v2518_v22  ;;  %v1157_v42 = vsel %vm901_vm6, %v2742_v61, 1.0 }
 0x124   : > { %1376 = vrot.lane.b32.xlu0 %v1278_v60, %s2519_s28  ;;  %v2328_v3 = vadd.f32 %v2327_v1, %v2326_v0  ;;  %v2329_v4 = vpop.f32.mrb[22].mxu0  ;;  %v1812_v0 = vld [vmem:[%s2874_s15 + $0x18] sm:$0xff] }
 0x125   : > { %v2330_v5 = vpop.f32.mrb[23].mxu0 }
 0x126   : > { %1378 = vrot.lane.b32.xlu1 %v1279_v62, %s2519_s28  ;;  %v2762_v7 = vadd.f32 %v2693_v25, %v2328_v3  ;;  %v2331_v9 = vadd.f32 %v2330_v5, %v2329_v4  ;;  %v1153_v25 = vsel %vm897_vm10, %v2704_v37, 1.0 }
 0x128   : > { %946 = vperm.xlu0 %2450, %v2699_v35   ;;  %v2765_v10 = vadd.f32 %v2404_v31, %v2331_v9  ;;  %vm902_vm7 = vcmp.gt.f32.partialorder %v2762_v7, 0.5  ;;  %v1281_v31 = vsel %vm897_vm10, 1, %v2518_v22 }
 0x129   : > { %v2771_v11 = vsel %vm902_vm7, 1, %v2518_v22  ;;  %v1158_v43 = vsel %vm902_vm7, %v2762_v7, 1.0 }
 0x12a   : > { %951 = vperm.xlu1 %2451, %v2704_v37   ;;  %v2332_v12 = vpop.f32.mrb[24].mxu0  ;;  %vm903_vm8 = vcmp.gt.f32.partialorder %v2765_v10, 0.5 }
 0x12b   : > { %v2333_v13 = vpop.f32.mrb[25].mxu0  ;;  %v2778_v14 = vsel %vm903_vm8, 1, %v2518_v22 }
 0x12c   : > { %1076 = vrot.lane.b32.xlu0 %v2699_v35, %s2517_s27  ;;  %v2334_v15 = vadd.f32 %v2333_v13, %v2332_v12  ;;  %v2335_v16 = vpop.f32.mrb[26].mxu0 }
 0x12d   : > { %v2336_v17 = vpop.f32.mrb[27].mxu0 }
 0x12e   : > { %1078 = vrot.lane.b32.xlu1 %v2704_v37, %s2517_s27  ;;  %v2337_v18 = vadd.f32 %v2336_v17, %v2335_v16  ;;  %v2787_v20 = vadd.f32 %v2334_v15, %v2709_v41  ;;  %v1156_v41 = vsel %vm900_vm5, %v2737_v59, 1.0  ;;  %v1813_v16 = vld [vmem:[%s2874_s15 + $0x20] sm:$0xff] }
 0x130   : > { %1186 = vperm.xlu0 %2450, %v1152_v23   ;;  %v2790_v24 = vadd.f32 %v2337_v18, %v816_v46  ;;  %vm904_vm12 = vcmp.gt.f32.partialorder %v2787_v20, 0.5  ;;  %v1814_v18 = vld [vmem:[%s2874_s15 + $0x28] sm:$0xff] }
 0x131   : > { %v1160_v48 = vsel %vm904_vm12, %v2787_v20, 1.0  ;;  %v1288_v55 = vsel %vm904_vm12, 1, %v2518_v22  ;;  %vm1532_vm12 = vcmask 64512  }
 0x132   : > { %1191 = vperm.xlu1 %2451, %v1153_v25   ;;  %v2338_v26 = vpop.f32.mrb[28].mxu0  ;;  %vm905_vm13 = vcmp.gt.f32.partialorder %v2790_v24, 0.5 }
 0x133   : > { %v2339_v28 = vpop.f32.mrb[29].mxu0  ;;  %v1289_v57 = vsel %vm905_vm13, 1, %v2518_v22 }
 0x134   : > { %1305 = vperm.xlu0 %2450, %v1280_v27   ;;  %v2340_v29 = vadd.f32 %v2339_v28, %v2338_v26  ;;  %v2341_v30 = vpop.f32.mrb[30].mxu0 }
 0x135   : > { %v2342_v32 = vpop.f32.mrb[31].mxu0 }
 0x136   : > { %1308 = vperm.xlu1 %2451, %v1281_v31   ;;  %v2796_v33 = vadd.f32 %v2707_v39, %v2340_v29  ;;  %v2343_v34 = vadd.f32 %v2342_v32, %v2341_v30  ;;  %v1155_v39 = vsel %vm899_vm4, %v2720_v49, 1.0  ;;  %v1816_v29 = vld [vmem:[%s2874_s15 + $0x38] sm:$0xff]  ;;  %v828_v30 = vld [vmem:[%s2956_s25] sm:$0xff]  ;;  %v829_v32 = vld [vmem:[%s2956_s25 + $0x8] sm:$0xff] }
 0x137   : > { %vm860_vm2 = vcmp.ne.f32.partialorder %v828_v30, %v828_v30  ;;  %vm861_vm3 = vcmp.ne.f32.partialorder %v829_v32, %v829_v32 }
 0x138   : > { %1380 = vrot.lane.b32.xlu0 %v1280_v27, %s2519_s28  ;;  %v2800_v36 = vadd.f32 %v2712_v44, %v2343_v34  ;;  %v1159_v44 = vsel %vm903_vm8, %v2765_v10, 1.0  ;;  %vm906_vm0 = vcmp.gt.f32.partialorder %v2796_v33, 0.5  ;;  %v1815_v27 = vld [vmem:[%s2874_s15 + $0x30] sm:$0xff]  ;;  %vm1453_vm8 = vcmp.ne.f32.partialorder %v2986_v50, %v2986_v50 }
 0x139   : > { %v1162_v5 = vsel %vm906_vm0, %v2796_v33, 1.0  ;;  %v1290_v13 = vsel %vm906_vm0, 1, %v2518_v22 }
 0x13a   : > { %1382 = vrot.lane.b32.xlu1 %v1281_v31, %s2519_s28  ;;  %vm907_vm1 = vcmp.gt.f32.partialorder %v2800_v36, 0.5 }
 0x13b   : > { %v1291_v15 = vsel %vm907_vm1, 1, %v2518_v22 }
 0x13c   : > { %956 = vperm.xlu0 %2450, %v2715_v47  }
 0x13e   : > { %961 = vperm.xlu1 %2451, %v2720_v49  }
 0x140   : > { %1080 = vrot.lane.b32.xlu0 %v2715_v47, %s2517_s27 }
 0x142   : > { %1082 = vrot.lane.b32.xlu1 %v2720_v49, %s2517_s27 }
 0x144   : > { %1196 = vperm.xlu0 %2450, %v1154_v38  }
 0x146   : > { %1201 = vperm.xlu1 %2451, %v1155_v39   ;;  %v876_v39 = vsel %vm860_vm2, 0.0, %v828_v30  ;;  %v3053_v30 = vld [vmem:[%s2977_s20 + $0x18] sm:$0xff] }
 0x148   : > { %1311 = vperm.xlu0 %2450, %v1282_v40  }
 0x14a   : > { %1314 = vperm.xlu1 %2451, %v2732_v53  }
 0x14c   : > { %1384 = vrot.lane.b32.xlu0 %v1282_v40, %s2519_s28 }
 0x14e   : > { %1386 = vrot.lane.b32.xlu1 %v2732_v53, %s2519_s28  ;;  %v1161_v53 = vsel %vm905_vm13, %v2790_v24, 1.0 }
 0x150   : > { %966 = vperm.xlu0 %2450, %v2737_v59  }
 0x152   : > { %971 = vperm.xlu1 %2451, %v2742_v61  }
 0x154   : > { %1084 = vrot.lane.b32.xlu0 %v2737_v59, %s2517_s27 }
 0x156   : > { %1086 = vrot.lane.b32.xlu1 %v2742_v61, %s2517_s27 }
 0x158   : > { %1206 = vperm.xlu0 %2450, %v1156_v41   ;;  %v908_v41 = vmul.f32 %v876_v39, %v876_v39 }
 0x15a   : > { %1211 = vperm.xlu1 %2451, %v1157_v42   ;;  %v877_v42 = vsel %vm861_vm3, 0.0, %v829_v32 }
 0x15b   : > { %v909_v45 = vmul.f32 %v877_v42, %v877_v42 }
 0x15c   : > { %1317 = vperm.xlu0 %2450, %v2751_v63  }
 0x15e   : > { %1320 = vperm.xlu1 %2451, %v2757_v2  }
 0x160   : > { %1388 = vrot.lane.b32.xlu0 %v2751_v63, %s2519_s28  ;;  %v1811_v63 = vld [vmem:[%s2874_s15 + $0x10] sm:$0xff] }
 0x161   : > { %2414 = vmatprep.mubr.msk.f32.mxu1 %vm3881_vm15, %v1811_v63 }
 0x162   : > { %1390 = vrot.lane.b32.xlu1 %v2757_v2, %s2519_s28  ;;  %2415 = vmatmul.mubr.msk.f32.gmra.mrb[18].mxu1 %vm3881_vm15, %v1812_v0  ;;  %v1021_v0 = vmul.f32 2.0, %v877_v42 }
 0x163   : > { %2417 = vmatprep.mubr.msk.f32.mxu1 %vm3881_vm15, %v1813_v16 }
 0x164   : > { %976 = vperm.xlu0 %2450, %v2762_v7   ;;  %v1037_v16 = vmul.f32 %v1021_v0, %v2673_v8 }
 0x166   : > { %981 = vperm.xlu1 %2451, %v2765_v10   ;;  %2418 = vmatmul.mubr.msk.f32.gmra.mrb[20].mxu1 %vm3881_vm15, %v1814_v18 }
 0x167   : > { %2420 = vmatprep.mubr.msk.f32.mxu1 %vm3881_vm15, %v1815_v27  ;;  %v2520_v27 = vmov 1.0  }
 0x168   : > { %1088 = vrot.lane.b32.xlu0 %v2762_v7, %s2517_s27 }
 0x16a   : > { %1090 = vrot.lane.b32.xlu1 %v2765_v10, %s2517_s27  ;;  %2421 = vmatmul.mubr.msk.f32.gmra.mrb[22].mxu1 %vm3881_vm15, %v1816_v29 }
 0x16c   : > { %1216 = vperm.xlu0 %2450, %v1158_v43  }
 0x16e   : > { %1221 = vperm.xlu1 %2451, %v1159_v44   ;;  %v1020_v44 = vmul.f32 2.0, %v876_v39 }
 0x170   : > { %1323 = vperm.xlu0 %2450, %v2771_v11  }
 0x172   : > { %1326 = vperm.xlu1 %2451, %v2778_v14  }
 0x174   : > { %1392 = vrot.lane.b32.xlu0 %v2771_v11, %s2519_s28  ;;  %v2883_v52 = vpop.permute.xlu1 %1070  ;;  %v1163_v11 = vsel %vm907_vm1, %v2800_v36, 1.0 }
 0x176   : > { %1394 = vrot.lane.b32.xlu1 %v2778_v14, %s2519_s28 }
 0x178   : > { %986 = vperm.xlu0 %2450, %v2787_v20  }
 0x17a   : > { %991 = vperm.xlu1 %2451, %v2790_v24  }
 0x17c   : > { %1092 = vrot.lane.b32.xlu0 %v2787_v20, %s2517_s27 }
 0x17e   : > { %1094 = vrot.lane.b32.xlu1 %v2790_v24, %s2517_s27 }
 0x17f   : > { %v2876_v46 = vpop.permute.xlu0 %926 }
 0x180   : > { %1226 = vperm.xlu0 %2450, %v1160_v48   ;;  %v1004_v63 = vmul.f32 %v2876_v46, %v908_v41  ;;  %v3042_v41 = vld [vmem:[%s2977_s20] sm:$0xff] }
 0x182   : > { %1231 = vperm.xlu1 %2451, %v1161_v53   ;;  %v1817_v53 = vld [vmem:[%s2874_s15 + $0x40] sm:$0xff] }
 0x183   : > { %v2890_v54 = vpop.permute.xlu0 %1068  ;;  %2423 = vmatprep.mubr.msk.f32.mxu1 %vm3881_vm15, %v1817_v53 }
 0x184   : > { %1329 = vperm.xlu0 %2450, %v1288_v55  }
 0x185   : > { %v2895_v56 = vpop.permute.xlu1 %1171 }
 0x186   : > { %1332 = vperm.xlu1 %2451, %v1289_v57  }
 0x187   : > { %v2900_v58 = vpop.permute.xlu0 %931 }
 0x188   : > { %1396 = vrot.lane.b32.xlu0 %v1288_v55, %s2519_s28  ;;  %v1818_v55 = vld [vmem:[%s2874_s15 + $0x48] sm:$0xff] }
 0x189   : > { %v2903_v60 = vpop.permute.xlu1 %1296  ;;  %2424 = vmatmul.mubr.msk.f32.gmra.mrb[24].mxu1 %vm3881_vm15, %v1818_v55 }
 0x18a   : > { %1398 = vrot.lane.b32.xlu1 %v1289_v57, %s2519_s28  ;;  %v1819_v57 = vld [vmem:[%s2874_s15 + $0x50] sm:$0xff]  ;;  %vm1341_vm6 = vcmp.eq.s32.totalorder %v2903_v60, 1 }
 0x18b   : > { %v2906_v62 = vpop.permute.xlu0 %1166  ;;  %2426 = vmatprep.mubr.msk.f32.mxu1 %vm3881_vm15, %v1819_v57 }
 0x18c   : > { %996 = vperm.xlu0 %2450, %v2796_v33   ;;  %2476 = vrcp.f32 %v2906_v62  ;;  %v1820_v62 = vld [vmem:[%s2874_s15 + $0x58] sm:$0xff] }
 0x18d   : > { %v1375_v1 = vpop.permute.xlu1 %1374  ;;  %2427 = vmatmul.mubr.msk.f32.gmra.mrb[26].mxu1 %vm3881_vm15, %v1820_v62  ;;  %2478 = vrcp.f32 %v2895_v56 }
 0x18e   : > { %1001 = vperm.xlu1 %2451, %v2800_v36   ;;  %vm1405_vm4 = vcmp.ne.s32.totalorder %v1375_v1, 0  ;;  %v830_v1 = vld [vmem:[%s2956_s25 + $0x10] sm:$0xff] }
 0x18f   : > { %v2914_v2 = vpop.permute.xlu0 %1293  ;;  %vm2981_vm5 = vmor %vm861_vm3, %vm1405_vm4  ;;  %vm862_vm9 = vcmp.ne.f32.partialorder %v830_v1, %v830_v1 }
 0x190   : > { %1096 = vrot.lane.b32.xlu0 %v2796_v33, %s2517_s27  ;;  %vm3007_vm7 = vmand %vm1341_vm6, %vm2981_vm5  ;;  %vm1340_vm3 = vcmp.eq.s32.totalorder %v2914_v2, 1  ;;  %vm1452_vm5 = vcmp.ne.f32.partialorder %v3042_v41, %v3042_v41 }
 0x191   : > { %v2919_v3 = vpop.permute.xlu1 %936  ;;  %v1517_v29 = vsel %vm3007_vm7, 0.0, %v2520_v27  ;;  %vm3027_vm13 = vmor %vm3007_vm7, %vm1453_vm8 }
 0x192   : > { %1098 = vrot.lane.b32.xlu1 %v2800_v36, %s2517_s27  ;;  %v1501_v55 = vsel %vm3027_vm13, 0.0, %v2986_v50 }
 0x193   : > { %v2924_v4 = vpop.permute.xlu0 %1372 }
 0x194   : > { %1236 = vperm.xlu0 %2450, %v1162_v5   ;;  %vm1404_vm10 = vcmp.ne.s32.totalorder %v2924_v4, 0  ;;  %v1632_v4 = vsel %vm1532_vm12, %v1517_v29, 0.0 }
 0x195   : > { %v2927_v9 = vpop.permute.xlu1 %941  ;;  %vm3037_vm14 = vmor %vm860_vm2, %vm1404_vm10 }
 0x196   : > { %1241 = vperm.xlu1 %2451, %v1163_v11   ;;  %v1036_v11 = vmul.f32 %v1020_v44, %v2671_v6  ;;  %v831_v6 = vld [vmem:[%s2956_s25 + $0x18] sm:$0xff]  ;;  %vm3065_vm4 = vmand %vm1340_vm3, %vm3037_vm14  ;;  %v2477_v0 = vpop.eup %2476  ;;  %v833_v44 = vld [vmem:[%s2956_s25 + $0x28] sm:$0xff] }
 0x197   : > { %v2930_v12 = vpop.permute.xlu0 %1072  ;;  %vm863_vm0 = vcmp.ne.f32.partialorder %v831_v6, %v831_v6  ;;  %vm3094_vm13 = vmor %vm3065_vm4, %vm1452_vm5 }
 0x198   : > { %1335 = vperm.xlu0 %2450, %v1290_v13  }
 0x199   : > { %v2933_v14 = vpop.permute.xlu1 %1074 }
 0x19a   : > { %1338 = vperm.xlu1 %2451, %v1291_v15  }
 0x19b   : > { %v2937_v17 = vpop.permute.xlu0 %1176 }
 0x19c   : > { %1400 = vrot.lane.b32.xlu0 %v1290_v13, %s2519_s28  ;;  %v1005_v13 = vmul.f32 %v2900_v58, %v909_v45  ;;  %2480 = vrcp.f32 %v2937_v17  ;;  %v1584_v17 = vsel %vm1532_vm12, %v1501_v55, 0.0  ;;  %v3125_v55 = vld [vmem:[%s2977_s20 + $0x10] sm:$0xff] }
 0x19d   : > { %v2943_v23 = vpop.permute.xlu1 %1181 }
 0x19e   : > { %1402 = vrot.lane.b32.xlu1 %v1291_v15, %s2519_s28  ;;  %v1052_v15 = vsub.f32 %v1004_v63, %v1036_v11  ;;  %v1053_v8 = vsub.f32 %v1005_v13, %v1037_v16  ;;  %v879_v63 = vsel %vm863_vm0, 0.0, %v831_v6  ;;  %2482 = vrcp.f32 %v2943_v23  ;;  %v837_v23 = vld [vmem:[%s2956_s25 + $0x48] sm:$0xff]  ;;  %s3697_s28 = scalar_lea.vmem %s3880_s9, %s2862_s11 }
 0x19f   : > { %v2946_v25 = vpop.permute.xlu0 %1299  ;;  %v911_v13 = vmul.f32 %v879_v63, %v879_v63 }
 0x1a0   : > { %v1116_v45 = vadd.f32 %v2890_v54, %v1052_v15  ;;  %v1117_v57 = vadd.f32 %v2883_v52, %v1053_v8 }
 0x1a1   : > { %v2948_v26 = vpop.permute.xlu1 %1302 }
 0x1a2   : > { %vm1343_vm2 = vcmp.eq.s32.totalorder %v2948_v26, 1  ;;  %v1132_v52 = vmax.f32 %v1116_v45, 0.0  ;;  %v1133_v8 = vmax.f32 %v1117_v57, 0.0  ;;  %v2479_v57 = vpop.eup %2478 }
 0x1a3   : > { %v2950_v22 = vpop.permute.xlu0 %1376 }
 0x1a4   : > { %vm1406_vm8 = vcmp.ne.s32.totalorder %v2950_v22, 0  ;;  %v1516_v22 = vsel %vm3065_vm4, 0.0, %v2520_v27 }
 0x1a5   : > { %v1379_v28 = vpop.permute.xlu1 %1378  ;;  %vm3100_vm14 = vmor %vm862_vm9, %vm1406_vm8 }
 0x1a6   : > { %vm1407_vm11 = vcmp.ne.s32.totalorder %v1379_v28, 0  ;;  %v878_v28 = vsel %vm862_vm9, 0.0, %v830_v1  ;;  %v1007_v1 = vmul.f32 %v2927_v9, %v911_v13  ;;  %vm1342_vm9 = vcmp.eq.s32.totalorder %v2946_v25, 1 }
 0x1a7   : > { %v2963_v31 = vpop.permute.xlu0 %946  ;;  %v910_v42 = vmul.f32 %v878_v28, %v878_v28  ;;  %vm3045_vm1 = vmor %vm863_vm0, %vm1407_vm11  ;;  %v1022_v48 = vmul.f32 2.0, %v878_v28  ;;  %vm1455_vm11 = vcmp.ne.f32.partialorder %v3053_v30, %v3053_v30 }
 0x1a8   : > { %vm3079_vm10 = vmand %vm1343_vm2, %vm3045_vm1 }
 0x1a9   : > { %v2966_v34 = vpop.permute.xlu1 %951  ;;  %v1006_v11 = vmul.f32 %v2919_v3, %v910_v42  ;;  %v1023_v3 = vmul.f32 2.0, %v879_v63  ;;  %v1038_v15 = vmul.f32 %v1022_v48, %v2684_v19  ;;  %v1519_v32 = vsel %vm3079_vm10, 0.0, %v2520_v27  ;;  %vm3111_vm0 = vmor %vm3079_vm10, %vm1455_vm11  ;;  %v832_v42 = vld [vmem:[%s2956_s25 + $0x20] sm:$0xff] }
 0x1aa   : > { %v1245_v19 = vmul.f32 %v2477_v0, %v1132_v52  ;;  %v1500_v48 = vsel %vm3094_vm13, 0.0, %v3042_v41  ;;  %v1638_v9 = vsel %vm1532_vm12, %v1519_v32, 0.0  ;;  %v1503_v41 = vsel %vm3111_vm0, 0.0, %v3053_v30  ;;  %vm3141_vm5 = vmand %vm1342_vm9, %vm3100_vm14 }
 0x1ab   : > { %v2968_v38 = vpop.permute.xlu0 %1076  ;;  %v1054_v39 = vsub.f32 %v1006_v11, %v1038_v15  ;;  %v1039_v0 = vmul.f32 %v1023_v3, %v2686_v21  ;;  %vm864_vm8 = vcmp.ne.f32.partialorder %v832_v42, %v832_v42  ;;  %vm865_vm11 = vcmp.ne.f32.partialorder %v833_v44, %v833_v44 }
 0x1ac   : > { %v1356_v21 = vsel %vm1340_vm3, %v1245_v19, 0.0  ;;  %vm1454_vm13 = vcmp.ne.f32.partialorder %v3125_v55, %v3125_v55  ;;  %v1581_v13 = vsel %vm1532_vm12, %v1500_v48, 0.0  ;;  %v1247_v52 = vmul.f32 %v2479_v57, %v1133_v8 }
 0x1ad   : > { %v2971_v40 = vpop.permute.xlu1 %1078  ;;  %v1118_v63 = vadd.f32 %v2930_v12, %v1054_v39  ;;  %v1055_v12 = vsub.f32 %v1007_v1, %v1039_v0  ;;  %v1590_v2 = vsel %vm1532_vm12, %v1503_v41, 0.0  ;;  %v1518_v6 = vsel %vm3141_vm5, 0.0, %v2520_v27  ;;  %vm3175_vm14 = vmor %vm3141_vm5, %vm1454_vm13 }
 0x1ae   : > { %v880_v15 = vsel %vm864_vm8, 0.0, %v832_v42  ;;  %v1468_v32 = vsel %vm3065_vm4, 0.0, %v1356_v21  ;;  %v881_v19 = vsel %vm865_vm11, 0.0, %v833_v44 }
 0x1af   : > { %v2979_v43 = vpop.permute.xlu0 %1186  ;;  %v1134_v3 = vmax.f32 %v1118_v63, 0.0  ;;  %v912_v28 = vmul.f32 %v880_v15, %v880_v15  ;;  %v1119_v1 = vadd.f32 %v2933_v14, %v1055_v12  ;;  %v913_v48 = vmul.f32 %v881_v19, %v881_v19 }
 0x1b0   : > { %v1533_v57 = vsel %vm1532_vm12, %v1468_v32, 0.0  ;;  %v1024_v63 = vmul.f32 2.0, %v880_v15  ;;  %v1025_v21 = vmul.f32 2.0, %v881_v19  ;;  %2484 = vrcp.f32 %v2979_v43 }
 0x1b1   : > { %v2988_v51 = vpop.permute.xlu1 %1191 }
 0x1b2   : > { %2486 = vrcp.f32 %v2988_v51 }
 0x1b3   : > { %v2998_v5 = vpop.permute.xlu0 %1305 }
 0x1b5   : > { %v3017_v58 = vpop.permute.xlu1 %1308 }
 0x1b6   : > { %vm1345_vm3 = vcmp.eq.s32.totalorder %v3017_v58, 1  ;;  %v1824_v58 = vld [vmem:[%s2874_s15 + $0x78] sm:$0xff] }
 0x1b7   : > { %v3020_v18 = vpop.permute.xlu0 %1380 }
 0x1b8   : > { %vm1408_vm0 = vcmp.ne.s32.totalorder %v3020_v18, 0  ;;  %v1357_v18 = vsel %vm1341_vm6, %v1247_v52, 0.0  ;;  %v835_v52 = vld [vmem:[%s2956_s25 + $0x38] sm:$0xff] }
 0x1b9   : > { %v1383_v56 = vpop.permute.xlu1 %1382  ;;  %v1469_v12 = vsel %vm3007_vm7, 0.0, %v1357_v18  ;;  %vm1344_vm7 = vcmp.eq.s32.totalorder %v2998_v5, 1 }
 0x1ba   : > { %vm1409_vm1 = vcmp.ne.s32.totalorder %v1383_v56, 0  ;;  %v1008_v56 = vmul.f32 %v2963_v31, %v912_v28  ;;  %v1040_v31 = vmul.f32 %v1024_v63, %v2699_v35  ;;  %v1041_v35 = vmul.f32 %v1025_v21, %v2704_v37 }
 0x1bb   : > { %1633 = vadd.xlane.f32.xlu0 %v1632_v4  ;;  %v3056_v53 = vpop.permute.xlu0 %956  ;;  %v1629_v4 = vsel %vm1532_vm12, %v1516_v22, 0.0  ;;  %vm3150_vm15 = vmor %vm865_vm11, %vm1409_vm1  ;;  %v2481_v22 = vpop.eup %2480  ;;  %vm867_vm11 = vcmp.ne.f32.partialorder %v835_v52, %v835_v52 }
 0x1bc   : > { %vm3185_vm1 = vmand %vm1345_vm3, %vm3150_vm15  ;;  %v1249_v44 = vmul.f32 %v2481_v22, %v1134_v3  ;;  %v2483_v41 = vpop.eup %2482  ;;  %v1009_v3 = vmul.f32 %v2966_v34, %v913_v48  ;;  %v1056_v51 = vsub.f32 %v1008_v56, %v1040_v31 }
 0x1bd   : > { %v3084_v62 = vpop.permute.xlu1 %961  ;;  %vm3202_vm15 = vmor %vm864_vm8, %vm1408_vm0  ;;  %v1521_v0 = vsel %vm3185_vm1, 0.0, %v2520_v27 }
 0x1be   : > { %v1358_v46 = vsel %vm1342_vm9, %v1249_v44, 0.0  ;;  %v1644_v15 = vsel %vm1532_vm12, %v1521_v0, 0.0  ;;  %vm3244_vm9 = vmand %vm1344_vm7, %vm3202_vm15  ;;  %v1057_v19 = vsub.f32 %v1009_v3, %v1041_v35  ;;  %v1120_v63 = vadd.f32 %v2968_v38, %v1056_v51 }
 0x1bf   : > { %1585 = vadd.xlane.f32.xlu0 %v1584_v17  ;;  %v3104_v29 = vpop.permute.xlu0 %1080  ;;  %v3158_v17 = vld [vmem:[%s2977_s20 + $0x28] sm:$0xff]  ;;  %v1470_v28 = vsel %vm3141_vm5, 0.0, %v1358_v46  ;;  %v1520_v37 = vsel %vm3244_vm9, 0.0, %v2520_v27 }
 0x1c0   : > { %vm1457_vm4 = vcmp.ne.f32.partialorder %v3158_v17, %v3158_v17  ;;  %v1641_v26 = vsel %vm1532_vm12, %v1520_v37, 0.0  ;;  %v1539_v21 = vsel %vm1532_vm12, %v1470_v28, 0.0  ;;  %v1121_v42 = vadd.f32 %v2971_v40, %v1057_v19  ;;  %v836_v28 = vld [vmem:[%s2956_s25 + $0x40] sm:$0xff]  ;;  %v839_v40 = vld [vmem:[%s2956_s25 + $0x58] sm:$0xff] }
 0x1c1   : > { %v3118_v45 = vpop.permute.xlu1 %1082  ;;  %vm3216_vm6 = vmor %vm3185_vm1, %vm1457_vm4 }
 0x1c2   : > { %1630 = vadd.xlane.f32.xlu1 %v1629_v4  ;;  %v1635_v4 = vsel %vm1532_vm12, %v1518_v6, 0.0  ;;  %v3227_v6 = vld [vmem:[%s2977_s20 + $0x20] sm:$0xff]  ;;  %v1505_v25 = vsel %vm3216_vm6, 0.0, %v3158_v17  ;;  %v1536_v17 = vsel %vm1532_vm12, %v1469_v12, 0.0  ;;  %v3292_v12 = vld [vmem:[%s2977_s20 + $0x38] sm:$0xff] }
 0x1c3   : > { %1639 = vadd.xlane.f32.xlu0 %v1638_v9  ;;  %v3132_v11 = vpop.permute.xlu0 %1196  ;;  %v1502_v9 = vsel %vm3175_vm14, 0.0, %v3125_v55  ;;  %v1135_v55 = vmax.f32 %v1119_v1, 0.0  ;;  %vm1456_vm13 = vcmp.ne.f32.partialorder %v3227_v6, %v3227_v6  ;;  %v1596_v1 = vsel %vm1532_vm12, %v1505_v25, 0.0 }
 0x1c4   : > { %vm3265_vm4 = vmor %vm3244_vm9, %vm1456_vm13  ;;  %vm1459_vm13 = vcmp.ne.f32.partialorder %v3292_v12, %v3292_v12  ;;  %2488 = vrcp.f32 %v3132_v11 }
 0x1c5   : > { %v3154_v30 = vpop.permute.xlu1 %1201  ;;  %v1251_v43 = vmul.f32 %v2483_v41, %v1135_v55  ;;  %v1504_v38 = vsel %vm3265_vm4, 0.0, %v3227_v6  ;;  %v1136_v6 = vmax.f32 %v1120_v63, 0.0 }
 0x1c6   : > { %1582 = vadd.xlane.f32.xlu1 %v1581_v13  ;;  %v834_v13 = vld [vmem:[%s2956_s25 + $0x30] sm:$0xff]  ;;  %v1593_v31 = vsel %vm1532_vm12, %v1504_v38, 0.0  ;;  %2490 = vrcp.f32 %v3154_v30 }
 0x1c7   : > { %1591 = vadd.xlane.f32.xlu0 %v1590_v2  ;;  %v3166_v16 = vpop.permute.xlu0 %1311  ;;  %v1587_v2 = vsel %vm1532_vm12, %v1502_v9, 0.0  ;;  %vm866_vm8 = vcmp.ne.f32.partialorder %v834_v13, %v834_v13  ;;  %v1359_v44 = vsel %vm1343_vm2, %v1251_v43, 0.0  ;;  %v1137_v43 = vmax.f32 %v1121_v42, 0.0 }
 0x1c8   : > { %vm1346_vm2 = vcmp.eq.s32.totalorder %v3166_v16, 1  ;;  %v1471_v55 = vsel %vm3079_vm10, 0.0, %v1359_v44 }
 0x1c9   : > { %v3192_v39 = vpop.permute.xlu1 %1314  ;;  %v1542_v25 = vsel %vm1532_vm12, %v1471_v55, 0.0  ;;  %v852_v55 = vld [vmem:[%s2977_s20 + $0x40] sm:$0xff] }
 0x1ca   : > { %1636 = vadd.xlane.f32.xlu1 %v1635_v4  ;;  %v882_v4 = vsel %vm866_vm8, 0.0, %v834_v13  ;;  %vm1347_vm6 = vcmp.eq.s32.totalorder %v3192_v39, 1 }
 0x1cb   : > { %1534 = vadd.xlane.f32.xlu0 %v1533_v57  ;;  %v1385_v60 = vpop.permute.xlu0 %1384  ;;  %v914_v48 = vmul.f32 %v882_v4, %v882_v4  ;;  %v883_v57 = vsel %vm867_vm11, 0.0, %v835_v52  ;;  %v1026_v56 = vmul.f32 2.0, %v882_v4  ;;  %v2485_v52 = vpop.eup %2484 }
 0x1cc   : > { %vm1410_vm14 = vcmp.ne.s32.totalorder %v1385_v60, 0  ;;  %v915_v14 = vmul.f32 %v883_v57, %v883_v57  ;;  %v3289_v60 = vld [vmem:[%s2977_s20 + $0x30] sm:$0xff]  ;;  %v2487_v46 = vpop.eup %2486  ;;  %v1253_v51 = vmul.f32 %v2485_v52, %v1136_v6 }
 0x1cd   : > { %v1387_v22 = vpop.permute.xlu1 %1386  ;;  %vm3274_vm5 = vmor %vm866_vm8, %vm1410_vm14  ;;  %v1010_v3 = vmul.f32 %v3056_v53, %v914_v48  ;;  %vm3927_vm14 = vcmask 31744  }
 0x1ce   : > { %1588 = vadd.xlane.f32.xlu1 %v1587_v2  ;;  %vm1411_vm0 = vcmp.ne.s32.totalorder %v1387_v22, 0  ;;  %vm3308_vm8 = vmand %vm1346_vm2, %vm3274_vm5  ;;  %v1027_v22 = vmul.f32 2.0, %v883_v57  ;;  %v1821_v2 = vld [vmem:[%s2874_s15 + $0x60] sm:$0xff]  ;;  %v1011_v35 = vmul.f32 %v3084_v62, %v915_v14  ;;  %v1360_v63 = vsel %vm1344_vm7, %v1253_v51, 0.0 }
 0x1cf   : > { %1645 = vadd.xlane.f32.xlu0 %v1644_v15  ;;  %v3235_v32 = vpop.permute.xlu0 %966  ;;  %vm3280_vm15 = vmor %vm867_vm11, %vm1411_vm0  ;;  %vm1458_vm11 = vcmp.ne.f32.partialorder %v3289_v60, %v3289_v60  ;;  %2429 = vmatprep.mubr.msk.f32.mxu1 %vm3927_vm14, %v1821_v2  ;;  %v1522_v53 = vsel %vm3308_vm8, 0.0, %v2520_v27  ;;  %v1472_v52 = vsel %vm3244_vm9, 0.0, %v1360_v63 }
 0x1d0   : > { %vm3316_vm10 = vmand %vm1347_vm6, %vm3280_vm15  ;;  %v1043_v30 = vmul.f32 %v1027_v22, %v2720_v49  ;;  %v1647_v48 = vsel %vm1532_vm12, %v1522_v53, 0.0  ;;  %vm868_vm15 = vcmp.ne.f32.partialorder %v836_v28, %v836_v28  ;;  %v853_v22 = vld [vmem:[%s2977_s20 + $0x48] sm:$0xff]  ;;  %v1545_v53 = vsel %vm1532_vm12, %v1472_v52, 0.0 }
 0x1d1   : > { %v3251_v8 = vpop.permute.xlu1 %971  ;;  %v1523_v62 = vsel %vm3316_vm10, 0.0, %v2520_v27  ;;  %vm3349_vm0 = vmor %vm3308_vm8, %vm1458_vm11  ;;  %vm869_vm11 = vcmp.ne.f32.partialorder %v837_v23, %v837_v23 }
 0x1d2   : > { %1537 = vadd.xlane.f32.xlu1 %v1536_v17  ;;  %v1042_v17 = vmul.f32 %v1026_v56, %v2715_v47  ;;  %v1822_v47 = vld [vmem:[%s2874_s15 + $0x68] sm:$0xff]  ;;  %vm3360_vm4 = vmor %vm3316_vm10, %vm1459_vm13  ;;  %v1059_v57 = vsub.f32 %v1011_v35, %v1043_v30  ;;  %v1650_v49 = vsel %vm1532_vm12, %v1523_v62, 0.0  ;;  %v1506_v9 = vsel %vm3349_vm0, 0.0, %v3289_v60 }
 0x1d3   : > { %1597 = vadd.xlane.f32.xlu0 %v1596_v1  ;;  %v3261_v18 = vpop.permute.xlu0 %1084  ;;  %v1255_v1 = vmul.f32 %v2487_v46, %v1137_v43  ;;  %vm3932_vm5 = vmmov %vm3927_vm14  ;;  %v1507_v0 = vsel %vm3360_vm4, 0.0, %v3292_v12  ;;  %v884_v60 = vsel %vm868_vm15, 0.0, %v836_v28  ;;  %v1599_v38 = vsel %vm1532_vm12, %v1506_v9, 0.0  ;;  %v2489_v46 = vpop.eup %2488 }
 0x1d4   : > { %2430 = vmatmul.mubr.msk.f32.gmra.mrb[28].mxu1 %vm3932_vm5, %v1822_v47  ;;  %v1058_v4 = vsub.f32 %v1010_v3, %v1042_v17  ;;  %vm3933_vm0 = vmmov %vm3932_vm5  ;;  %v1123_v12 = vadd.f32 %v3118_v45, %v1059_v57  ;;  %v916_v6 = vmul.f32 %v884_v60, %v884_v60  ;;  %v885_v3 = vsel %vm869_vm11, 0.0, %v837_v23 }
 0x1d5   : > { %v3284_v41 = vpop.permute.xlu1 %1086  ;;  %vm3936_vm5 = vmmov %vm3933_vm0  ;;  %v1028_v43 = vmul.f32 2.0, %v884_v60  ;;  %v917_v51 = vmul.f32 %v885_v3, %v885_v3 }
 0x1d6   : > { %1642 = vadd.xlane.f32.xlu1 %v1641_v26  ;;  %v1361_v26 = vsel %vm1345_vm3, %v1255_v1, 0.0  ;;  %v1122_v42 = vadd.f32 %v3104_v29, %v1058_v4  ;;  %v1602_v29 = vsel %vm1532_vm12, %v1507_v0, 0.0  ;;  %v1139_v54 = vmax.f32 %v1123_v12, 0.0 }
 0x1d7   : > { %1540 = vadd.xlane.f32.xlu0 %v1539_v21  ;;  %v3302_v13 = vpop.permute.xlu0 %1206  ;;  %v1823_v21 = vld [vmem:[%s2874_s15 + $0x70] sm:$0xff]  ;;  %v1473_v2 = vsel %vm3185_vm1, 0.0, %v1361_v26  ;;  %v1012_v37 = vmul.f32 %v3235_v32, %v916_v6  ;;  %v1029_v4 = vmul.f32 2.0, %v885_v3  ;;  %v1044_v9 = vmul.f32 %v1028_v43, %v2737_v59 }
 0x1d8   : > { %2432 = vmatprep.mubr.msk.f32.mxu1 %vm3933_vm0, %v1823_v21  ;;  %vm1461_vm0 = vcmp.ne.f32.partialorder %v853_v22, %v853_v22  ;;  %v1548_v17 = vsel %vm1532_vm12, %v1473_v2, 0.0  ;;  %2492 = vrcp.f32 %v3302_v13  ;;  %v854_v2 = vld [vmem:[%s2977_s20 + $0x50] sm:$0xff] }
 0x1d9   : > { %v3326_v15 = vpop.permute.xlu1 %1211  ;;  %2433 = vmatmul.mubr.msk.f32.gmra.mrb[30].mxu1 %vm3936_vm5, %v1824_v58  ;;  %v1060_v0 = vsub.f32 %v1012_v37, %v1044_v9  ;;  %v1045_v26 = vmul.f32 %v1029_v4, %v2742_v61 }
 0x1da   : > { %1594 = vadd.xlane.f32.xlu1 %v1593_v31  ;;  %v2491_v31 = vpop.eup %2490  ;;  %2494 = vrcp.f32 %v3326_v15 }
 0x1db   : > { %1543 = vadd.xlane.f32.xlu0 %v1542_v25  ;;  %v3339_v19 = vpop.permute.xlu0 %1317  ;;  %v1138_v25 = vmax.f32 %v1122_v42, 0.0  ;;  %v1259_v30 = vmul.f32 %v2491_v31, %v1139_v54 }
 0x1dc   : > { %vm1348_vm7 = vcmp.eq.s32.totalorder %v3339_v19, 1 }
 0x1dd   : > { %v3366_v44 = vpop.permute.xlu1 %1320  ;;  %v1257_v62 = vmul.f32 %v2489_v46, %v1138_v25  ;;  %v1363_v59 = vsel %vm1347_vm6, %v1259_v30, 0.0  ;;  %v855_v46 = vld [vmem:[%s2977_s20 + $0x58] sm:$0xff] }
 0x1de   : > { %1648 = vadd.xlane.f32.xlu1 %v1647_v48  ;;  %v1475_v61 = vsel %vm3316_vm10, 0.0, %v1363_v59 }
 0x1df   : > { %1651 = vadd.xlane.f32.xlu0 %v1650_v49  ;;  %v1389_v14 = vpop.permute.xlu0 %1388  ;;  %v1013_v49 = vmul.f32 %v3251_v8, %v917_v51 }
 0x1e0   : > { %vm1412_vm13 = vcmp.ne.s32.totalorder %v1389_v14, 0  ;;  %v1362_v14 = vsel %vm1346_vm2, %v1257_v62, 0.0 }
 0x1e1   : > { %vm1428_vm14 = vmor %vm868_vm15, %vm1412_vm13  ;;  %v1391_v5 = vpop.permute.xlu1 %1390  ;;  %vm1349_vm15 = vcmp.eq.s32.totalorder %v3366_v44, 1  ;;  %v1061_v42 = vsub.f32 %v1013_v49, %v1045_v26  ;;  %v1474_v60 = vsel %vm3308_vm8, 0.0, %v1362_v14  ;;  %vm871_vm8 = vcmp.ne.f32.partialorder %v839_v40, %v839_v40 }
 0x1e2   : > { %vm3392_vm3 = vmand %vm1348_vm7, %vm1428_vm14  ;;  %vm1413_vm4 = vcmp.ne.s32.totalorder %v1391_v5, 0  ;;  %1600 = vadd.xlane.f32.xlu1 %v1599_v38  ;;  %vm1460_vm14 = vcmp.ne.f32.partialorder %v852_v55, %v852_v55  ;;  %v838_v5 = vld [vmem:[%s2956_s25 + $0x50] sm:$0xff]  ;;  %v1124_v38 = vadd.f32 %v3261_v18, %v1060_v0  ;;  %v1551_v58 = vsel %vm1532_vm12, %v1474_v60, 0.0  ;;  %v2493_v52 = vpop.eup %2492  ;;  %v841_v60 = vld [vmem:[%s2956_s25 + $0x68] sm:$0xff] }
 0x1e3   : > { %vm1429_vm13 = vmor %vm869_vm11, %vm1413_vm4  ;;  %1603 = vadd.xlane.f32.xlu0 %v1602_v29  ;;  %v3403_v45 = vpop.permute.xlu0 %976  ;;  %v1524_v28 = vsel %vm3392_vm3, 0.0, %v2520_v27  ;;  %v1125_v12 = vadd.f32 %v3284_v41, %v1061_v42  ;;  %vm870_vm2 = vcmp.ne.f32.partialorder %v838_v5, %v838_v5  ;;  %v1554_v29 = vsel %vm1532_vm12, %v1475_v61, 0.0 }
 0x1e4   : > { %vm3410_vm9 = vmand %vm1349_vm15, %vm1429_vm13  ;;  %v1653_v57 = vsel %vm1532_vm12, %v1524_v28, 0.0  ;;  %v1140_v50 = vmax.f32 %v1124_v38, 0.0  ;;  %v2495_v6 = vpop.eup %2494  ;;  %v886_v18 = vsel %vm870_vm2, 0.0, %v838_v5 }
 0x1e5   : > { %v3414_v35 = vpop.permute.xlu1 %981  ;;  %v1525_v47 = vsel %vm3410_vm9, 0.0, %v2520_v27  ;;  %vm3429_vm1 = vmor %vm3392_vm3, %vm1460_vm14  ;;  %v1141_v3 = vmax.f32 %v1125_v12, 0.0  ;;  %vm1462_vm14 = vcmp.ne.f32.partialorder %v854_v2, %v854_v2  ;;  %v918_v51 = vmul.f32 %v886_v18, %v886_v18 }
 0x1e6   : > { %1546 = vadd.xlane.f32.xlu1 %v1545_v53  ;;  %vm3436_vm11 = vmor %vm3410_vm9, %vm1461_vm0  ;;  %v1656_v32 = vsel %vm1532_vm12, %v1525_v47, 0.0  ;;  %v1508_v63 = vsel %vm3429_vm1, 0.0, %v852_v55  ;;  %v1261_v31 = vmul.f32 %v2493_v52, %v1140_v50  ;;  %v1030_v62 = vmul.f32 2.0, %v886_v18 }
 0x1e7   : > { %1549 = vadd.xlane.f32.xlu0 %v1548_v17  ;;  %v3421_v11 = vpop.permute.xlu0 %1088  ;;  %v1509_v8 = vsel %vm3436_vm11, 0.0, %v853_v22  ;;  %v1605_v16 = vsel %vm1532_vm12, %v1508_v63, 0.0  ;;  %vm1463_vm11 = vcmp.ne.f32.partialorder %v855_v46, %v855_v46  ;;  %v1263_v54 = vmul.f32 %v2495_v6, %v1141_v3 }
 0x1e8   : > { %v1608_v15 = vsel %vm1532_vm12, %v1509_v8, 0.0  ;;  %v887_v47 = vsel %vm871_vm8, 0.0, %v839_v40  ;;  %v1364_v37 = vsel %vm1348_vm7, %v1261_v31, 0.0  ;;  %v1014_v63 = vmul.f32 %v3403_v45, %v918_v51 }
 0x1e9   : > { %v3441_v48 = vpop.permute.xlu1 %1090  ;;  %v919_v4 = vmul.f32 %v887_v47, %v887_v47  ;;  %v1031_v14 = vmul.f32 2.0, %v887_v47  ;;  %v1476_v59 = vsel %vm3392_vm3, 0.0, %v1364_v37  ;;  %v1046_v44 = vmul.f32 %v1030_v62, %v2762_v7 }
 0x1ea   : > { %1654 = vadd.xlane.f32.xlu1 %v1653_v57  ;;  %v1557_v42 = vsel %vm1532_vm12, %v1476_v59, 0.0  ;;  %vm873_vm3 = vcmp.ne.f32.partialorder %v841_v60, %v841_v60 }
 0x1eb   : > { %1657 = vadd.xlane.f32.xlu0 %v1656_v32  ;;  %v3452_v13 = vpop.permute.xlu0 %1216  ;;  %v1365_v32 = vsel %vm1349_vm15, %v1263_v54, 0.0  ;;  %v1015_v0 = vmul.f32 %v3414_v35, %v919_v4  ;;  %v1047_v56 = vmul.f32 %v1031_v14, %v2765_v10  ;;  %v3549_v10 = vld [vmem:[%s2956_s25 + $0x70] sm:$0xff]  ;;  %v889_v50 = vsel %vm873_vm3, 0.0, %v841_v60 }
 0x1ec   : > { %2496 = vrcp.f32 %v3452_v13  ;;  %v1477_v13 = vsel %vm3410_vm9, 0.0, %v1365_v32  ;;  %vm874_vm9 = vcmp.ne.f32.partialorder %v3549_v10, %v3549_v10  ;;  %v921_v54 = vmul.f32 %v889_v50, %v889_v50 }
 0x1ed   : > { %v3459_v21 = vpop.permute.xlu1 %1221  ;;  %v1063_v7 = vsub.f32 %v1015_v0, %v1047_v56  ;;  %v1033_v47 = vmul.f32 2.0, %v889_v50 }
 0x1ee   : > { %1606 = vadd.xlane.f32.xlu1 %v1605_v16  ;;  %2498 = vrcp.f32 %v3459_v21  ;;  %v1062_v16 = vsub.f32 %v1014_v63, %v1046_v44  ;;  %v1560_v21 = vsel %vm1532_vm12, %v1477_v13, 0.0 }
 0x1ef   : > { %1609 = vadd.xlane.f32.xlu0 %v1608_v15  ;;  %v3466_v39 = vpop.permute.xlu0 %1323  ;;  %v840_v15 = vld [vmem:[%s2956_s25 + $0x60] sm:$0xff]  ;;  %v1127_v38 = vadd.f32 %v3441_v48, %v1063_v7 }
 0x1f0   : > { %vm1350_vm10 = vcmp.eq.s32.totalorder %v3466_v39, 1  ;;  %v1126_v34 = vadd.f32 %v3421_v11, %v1062_v16  ;;  %vm872_vm7 = vcmp.ne.f32.partialorder %v840_v15, %v840_v15 }
 0x1f1   : > { %v3471_v55 = vpop.permute.xlu1 %1326 }
 0x1f2   : > { %1552 = vadd.xlane.f32.xlu1 %v1551_v58  ;;  %vm3882_vm0 = vcmp.eq.s32.totalorder %v3471_v55, 1  ;;  %v3553_v58 = vld [vmem:[%s2956_s25 + $0x78] sm:$0xff]  ;;  %v1142_v52 = vmax.f32 %v1126_v34, 0.0 }
 0x1f3   : > { %1555 = vadd.xlane.f32.xlu0 %v1554_v29  ;;  %v1393_v22 = vpop.permute.xlu0 %1392  ;;  %v856_v29 = vld [vmem:[%s2977_s20 + $0x60] sm:$0xff] }
 0x1f4   : > { %vm1414_vm6 = vcmp.ne.s32.totalorder %v1393_v22, 0  ;;  %v857_v22 = vld [vmem:[%s2977_s20 + $0x68] sm:$0xff] }
 0x1f5   : > { %vm1430_vm4 = vmor %vm870_vm2, %vm1414_vm6  ;;  %v1395_v41 = vpop.permute.xlu1 %1394 }
 0x1f6   : > { %vm3484_vm5 = vmand %vm1350_vm10, %vm1430_vm4  ;;  %vm1415_vm13 = vcmp.ne.s32.totalorder %v1395_v41, 0  ;;  %v2497_v12 = vpop.eup %2496 }
 0x1f7   : > { %vm1431_vm1 = vmor %vm871_vm8, %vm1415_vm13  ;;  %v3490_v43 = vpop.permute.xlu0 %986  ;;  %v1526_v53 = vsel %vm3484_vm5, 0.0, %v2520_v27  ;;  %v1265_v6 = vmul.f32 %v2497_v12, %v1142_v52 }
 0x1f8   : > { %vm3497_vm2 = vmand %vm3882_vm0, %vm1431_vm1  ;;  %v1659_v28 = vsel %vm1532_vm12, %v1526_v53, 0.0  ;;  %v2499_v11 = vpop.eup %2498 }
 0x1f9   : > { %v3503_v1 = vpop.permute.xlu1 %991  ;;  %1660 = vadd.xlane.f32.xlu1 %v1659_v28  ;;  %v1527_v30 = vsel %vm3497_vm2, 0.0, %v2520_v27  ;;  %vm1494_vm6 = vmor %vm3484_vm5, %vm1462_vm14  ;;  %vm875_vm14 = vcmp.ne.f32.partialorder %v3553_v58, %v3553_v58 }
 0x1fa   : > { %v1662_v23 = vsel %vm1532_vm12, %v1527_v30, 0.0  ;;  %v1510_v57 = vsel %vm1494_vm6, 0.0, %v854_v2  ;;  %vm1495_vm8 = vmor %vm3497_vm2, %vm1463_vm11  ;;  %v888_v2 = vsel %vm872_vm7, 0.0, %v840_v15  ;;  %vm1464_vm6 = vcmp.ne.f32.partialorder %v856_v29, %v856_v29 }
 0x1fb   : > { %1663 = vadd.xlane.f32.xlu0 %v1662_v23  ;;  %v3517_v49 = vpop.permute.xlu0 %1092  ;;  %v1511_v9 = vsel %vm1495_vm8, 0.0, %v855_v46  ;;  %v1611_v19 = vsel %vm1532_vm12, %v1510_v57, 0.0  ;;  %v1143_v46 = vmax.f32 %v1127_v38, 0.0  ;;  %v920_v41 = vmul.f32 %v888_v2, %v888_v2 }
 0x1fc   : > { %v1614_v26 = vsel %vm1532_vm12, %v1511_v9, 0.0  ;;  %v1032_v62 = vmul.f32 2.0, %v888_v2  ;;  %v890_v30 = vsel %vm874_vm9, 0.0, %v3549_v10  ;;  %v1366_v57 = vsel %vm1350_vm10, %v1265_v6, 0.0 }
 0x1fd   : > { %v3524_v8 = vpop.permute.xlu1 %1094  ;;  %1612 = vadd.xlane.f32.xlu1 %v1611_v19  ;;  %v1267_v53 = vmul.f32 %v2499_v11, %v1143_v46  ;;  %v891_v9 = vsel %vm875_vm14, 0.0, %v3553_v58  ;;  %v1016_v39 = vmul.f32 %v3490_v43, %v920_v41  ;;  %v922_v19 = vmul.f32 %v890_v30, %v890_v30  ;;  %v858_v41 = vld [vmem:[%s2977_s20 + $0x70] sm:$0xff] }
 0x1fe   : > { %v923_v59 = vmul.f32 %v891_v9, %v891_v9  ;;  %vm3955_vm10 = vcmp.eq.s32.totalorder %v3471_v55, 1  ;;  %v1017_v13 = vmul.f32 %v3503_v1, %v921_v54  ;;  %v1048_v56 = vmul.f32 %v1032_v62, %v2787_v20 }
 0x1ff   : > { %1615 = vadd.xlane.f32.xlu0 %v1614_v26  ;;  %v3532_v45 = vpop.permute.xlu0 %1226  ;;  %v1367_v26 = vsel %vm3955_vm10, %v1267_v53, 0.0  ;;  %v1034_v43 = vmul.f32 2.0, %v890_v30  ;;  %v1478_v7 = vsel %vm3484_vm5, 0.0, %v1366_v57  ;;  %v1035_v55 = vmul.f32 2.0, %v891_v9 }
 0x200   : > { %2500 = vrcp.f32 %v3532_v45  ;;  %v1064_v1 = vsub.f32 %v1016_v39, %v1048_v56  ;;  %v1479_v20 = vsel %vm3497_vm2, 0.0, %v1367_v26  ;;  %v1563_v38 = vsel %vm1532_vm12, %v1478_v7, 0.0 }
 0x201   : > { %v3538_v35 = vpop.permute.xlu1 %1231  ;;  %1558 = vadd.xlane.f32.xlu1 %v1557_v42  ;;  %v1050_v25 = vmul.f32 %v1034_v43, %v2796_v33 }
 0x202   : > { %2502 = vrcp.f32 %v3538_v35 }
 0x203   : > { %1561 = vadd.xlane.f32.xlu0 %v1560_v21  ;;  %v3543_v5 = vpop.permute.xlu0 %1329  ;;  %v1049_v21 = vmul.f32 %v1033_v47, %v2790_v24  ;;  %v1051_v24 = vmul.f32 %v1035_v55, %v2800_v36 }
 0x204   : > { %vm1352_vm4 = vcmp.eq.s32.totalorder %v3543_v5, 1 }
 0x205   : > { %v3546_v61 = vpop.permute.xlu1 %1332  ;;  %v1065_v34 = vsub.f32 %v1017_v13, %v1049_v21 }
 0x206   : > { %vm1353_vm8 = vcmp.eq.s32.totalorder %v3546_v61, 1 }
 0x207   : > { %v1397_v40 = vpop.permute.xlu0 %1396 }
 0x208   : > { %vm1416_vm15 = vcmp.ne.s32.totalorder %v1397_v40, 0  ;;  %v1566_v40 = vsel %vm1532_vm12, %v1479_v20, 0.0 }
 0x209   : > { %vm1432_vm13 = vmor %vm872_vm7, %vm1416_vm15  ;;  %v1399_v48 = vpop.permute.xlu1 %1398  ;;  %vm1465_vm7 = vcmp.ne.f32.partialorder %v857_v22, %v857_v22 }
 0x20a   : > { %vm3565_vm1 = vmand %vm1352_vm4, %vm1432_vm13  ;;  %vm1417_vm11 = vcmp.ne.s32.totalorder %v1399_v48, 0  ;;  %v2501_v50 = vpop.eup %2500 }
 0x20b   : > { %vm1433_vm0 = vmor %vm873_vm3, %vm1417_vm11  ;;  %v997_v3 = vpop.permute.xlu0 %996  ;;  %v1528_v31 = vsel %vm3565_vm1, 0.0, %v2520_v27 }
 0x20c   : > { %vm3576_vm15 = vmand %vm1353_vm8, %vm1433_vm0  ;;  %v1665_v28 = vsel %vm1532_vm12, %v1528_v31, 0.0  ;;  %v1018_v60 = vmul.f32 %v997_v3, %v922_v19  ;;  %v2503_v33 = vpop.eup %2502  ;;  %v859_v31 = vld [vmem:[%s2977_s20 + $0x78] sm:$0xff] }
 0x20d   : > { %v1002_v37 = vpop.permute.xlu1 %1001  ;;  %1666 = vadd.xlane.f32.xlu1 %v1665_v28  ;;  %v1529_v4 = vsel %vm3576_vm15, 0.0, %v2520_v27  ;;  %vm3591_vm0 = vmor %vm3565_vm1, %vm1464_vm6  ;;  %vm1467_vm10 = vcmp.ne.f32.partialorder %v859_v31, %v859_v31 }
 0x20e   : > { %v1668_v32 = vsel %vm1532_vm12, %v1529_v4, 0.0  ;;  %v1512_v63 = vsel %vm3591_vm0, 0.0, %v856_v29  ;;  %vm3607_vm3 = vmor %vm3576_vm15, %vm1465_vm7  ;;  %v1019_v35 = vmul.f32 %v1002_v37, %v923_v59  ;;  %v1128_v29 = vadd.f32 %v3517_v49, %v1064_v1 }
 0x20f   : > { %1669 = vadd.xlane.f32.xlu0 %v1668_v32  ;;  %v1097_v0 = vpop.permute.xlu0 %1096  ;;  %v1513_v44 = vsel %vm3607_vm3, 0.0, %v857_v22  ;;  %v1617_v16 = vsel %vm1532_vm12, %v1512_v63, 0.0  ;;  %v1066_v17 = vsub.f32 %v1018_v60, %v1050_v25  ;;  %v1129_v22 = vadd.f32 %v3524_v8, %v1065_v34  ;;  %v3689_v34 = vld [vmem:[%s3879_s8] ss:$0 sm:$0xff]  ;;  %v2413_v25 = vpop.f32.mrb[16].mxu1 }
 0x210   : > { %v1620_v15 = vsel %vm1532_vm12, %v1513_v44, 0.0  ;;  %v1067_v11 = vsub.f32 %v1019_v35, %v1051_v24  ;;  %v1144_v48 = vmax.f32 %v1128_v29, 0.0  ;;  %vm1466_vm7 = vcmp.ne.f32.partialorder %v858_v41, %v858_v41  ;;  %v1952_v24 = vpop.f32.mrb[17].mxu1 }
 0x211   : > { %v1099_v42 = vpop.permute.xlu1 %1098  ;;  %1618 = vadd.xlane.f32.xlu1 %v1617_v16  ;;  %v1130_v46 = vadd.f32 %v1097_v0, %v1066_v17  ;;  %v1145_v36 = vmax.f32 %v1129_v22, 0.0  ;;  %v1953_v17 = vadd.f32 %v3689_v34, %v1952_v24 }
 0x212   : > { %v1131_v3 = vadd.f32 %v1099_v42, %v1067_v11  ;;  %v1269_v53 = vmul.f32 %v2501_v50, %v1144_v48  ;;  %v1678_v42 = vlaneseq }
 0x213   : > { %1621 = vadd.xlane.f32.xlu0 %v1620_v15  ;;  %v1237_v45 = vpop.permute.xlu0 %1236  ;;  %v1271_v54 = vmul.f32 %v2503_v33, %v1145_v36  ;;  %v1146_v62 = vmax.f32 %v1130_v46, 0.0  ;;  %2031 = vst.msk [vmem:[%s3697_s28] sm:$0xff] %vm1532_vm12, %v1953_v17  ;;  %v3715_v46 = vld [vmem:[%s3877_s6] ss:$0 sm:$0xff] }
 0x214   : > { %2504 = vrcp.f32 %v1237_v45  ;;  %v1147_v10 = vmax.f32 %v1131_v3, 0.0  ;;  %v1368_v37 = vsel %vm1352_vm4, %v1269_v53, 0.0  ;;  %v1679_v21 = vshrl.u32 %v1678_v42, 7 }
 0x215   : > { %v1242_v12 = vpop.permute.xlu1 %1241  ;;  %1564 = vadd.xlane.f32.xlu1 %v1563_v38  ;;  %v1369_v23 = vsel %vm1353_vm8, %v1271_v54, 0.0  ;;  %v1480_v5 = vsel %vm3565_vm1, 0.0, %v1368_v37 }
 0x216   : > { %2506 = vrcp.f32 %v1242_v12  ;;  %v1481_v61 = vsel %vm3576_vm15, 0.0, %v1369_v23  ;;  %v1569_v19 = vsel %vm1532_vm12, %v1480_v5, 0.0  ;;  %v1680_v1 = vsub.s32 0, %v1679_v21 }
 0x217   : > { %1567 = vadd.xlane.f32.xlu0 %v1566_v40  ;;  %v1336_v52 = vpop.permute.xlu0 %1335  ;;  %v1572_v59 = vsel %vm1532_vm12, %v1481_v61, 0.0  ;;  %v1700_v60 = vsub.s32 1, %v1679_v21  ;;  %v1736_v35 = vsub.s32 2, %v1679_v21  ;;  %v1958_v12 = vadd.f32 %v2413_v25, %v3689_v34 }
 0x218   : > { %vm1354_vm2 = vcmp.eq.s32.totalorder %v1336_v52, 1 }
 0x219   : > { %v1339_v2 = vpop.permute.xlu1 %1338  ;;  %2032 = vst.msk [vmem:[%s3697_s28 + $0x8] sm:$0xff] %vm1532_vm12, %v1958_v12 }
 0x21a   : > { %vm1355_vm0 = vcmp.eq.s32.totalorder %v1339_v2, 1 }
 0x21b   : > { %v1401_v6 = vpop.permute.xlu0 %1400 }
 0x21c   : > { %vm1418_vm5 = vcmp.ne.s32.totalorder %v1401_v6, 0 }
 0x21d   : > { %vm1434_vm13 = vmor %vm874_vm9, %vm1418_vm5  ;;  %v1403_v49 = vpop.permute.xlu1 %1402 }
 0x21e   : > { %v2505_v8 = vpop.eup %2504  ;;  %vm3639_vm11 = vmand %vm1354_vm2, %vm1434_vm13  ;;  %vm1419_vm6 = vcmp.ne.s32.totalorder %v1403_v49, 0 }
 0x21f   : > { %vm1435_vm3 = vmor %vm875_vm14, %vm1419_vm6  ;;  %v1273_v4 = vmul.f32 %v2505_v8, %v1146_v62  ;;  %v1530_v26 = vsel %vm3639_vm11, 0.0, %v2520_v27 }
 0x220   : > { %v2507_v47 = vpop.eup %2506  ;;  %vm3647_vm9 = vmand %vm1355_vm0, %vm1435_vm3  ;;  %v1671_v16 = vsel %vm1532_vm12, %v1530_v26, 0.0 }
 0x221   : > { %vm1498_vm5 = vmor %vm3639_vm11, %vm1466_vm7  ;;  %v1275_v58 = vmul.f32 %v2507_v47, %v1147_v10  ;;  %v1370_v14 = vsel %vm1354_vm2, %v1273_v4, 0.0  ;;  %v1531_v13 = vsel %vm3647_vm9, 0.0, %v2520_v27  ;;  %v1677_v27 = vld [vmem:[%s3876_s5] sm:$0x7] }
 0x222   : > { %v1514_v57 = vsel %vm1498_vm5, 0.0, %v858_v41  ;;  %vm1499_vm14 = vmor %vm3647_vm9, %vm1467_vm10  ;;  %v1482_v0 = vsel %vm3639_vm11, 0.0, %v1370_v14  ;;  %v1674_v56 = vsel %vm1532_vm12, %v1531_v13, 0.0  ;;  %v3691_v38 = vrot.slane %v1677_v27, %v1680_v1 }
 0x223   : > { %v1623_v9 = vsel %vm1532_vm12, %v1514_v57, 0.0  ;;  %v1515_v32 = vsel %vm1499_vm14, 0.0, %v859_v31  ;;  %v1371_v39 = vsel %vm1355_vm0, %v1275_v58, 0.0  ;;  %v1575_v44 = vsel %vm1532_vm12, %v1482_v0, 0.0 }
 0x224   : > { %1624 = vadd.xlane.f32.xlu1 %v1623_v9  ;;  %v1626_v63 = vsel %vm1532_vm12, %v1515_v32, 0.0  ;;  %v1483_v18 = vsel %vm3647_vm9, 0.0, %v1371_v39  ;;  %v3700_v40 = vrot.slane %v1677_v27, %v1700_v60  ;;  %v3705_v22 = vrot.slane %v1677_v27, %v1736_v35 }
 0x225   : > { %1627 = vadd.xlane.f32.xlu0 %v1626_v63  ;;  %v1578_v51 = vsel %vm1532_vm12, %v1483_v18, 0.0 }
 0x228   : > { %1570 = vadd.xlane.f32.xlu1 %v1569_v19 }
 0x229   : > { %1573 = vadd.xlane.f32.xlu0 %v1572_v59 }
 0x22c   : > { %1576 = vadd.xlane.f32.xlu1 %v1575_v44 }
 0x22d   : > { %1579 = vadd.xlane.f32.xlu0 %v1578_v51 }
 0x230   : > { %1672 = vadd.xlane.f32.xlu1 %v1671_v16 }
 0x231   : > { %1675 = vadd.xlane.f32.xlu0 %v1674_v56 }
 0x235   : > { %v2416_v8 = vpop.f32.mrb[18].mxu1 }
 0x236   : > { %v1968_v28 = vadd.f32 %v2416_v8, %v3689_v34  ;;  %v1962_v62 = vpop.f32.mrb[19].mxu1 }
 0x237   : > { %v1963_v30 = vadd.f32 %v3689_v34, %v1962_v62 }
 0x238   : > { %2034 = vst.msk [vmem:[%s3697_s28 + $0x18] sm:$0xff] %vm1532_vm12, %v1968_v28 }
 0x239   : > { %2033 = vst.msk [vmem:[%s3697_s28 + $0x10] sm:$0xff] %vm1532_vm12, %v1963_v30  ;;  %v2419_v42 = vpop.f32.mrb[20].mxu1 }
 0x23a   : > { %v1978_v21 = vadd.f32 %v2419_v42, %v3689_v34 }
 0x23c   : > { %2036 = vst.msk [vmem:[%s3697_s28 + $0x28] sm:$0xff] %vm1532_vm12, %v1978_v21 }
 0x248   : > { %v1634_v43 = vpop.xlane.xlu0 %1633 }
 0x249   : > { %v1739_v47 = vmul.f32 %v3705_v22, %v1634_v43 }
 0x24c   : > { %v1586_v7 = vpop.xlane.xlu0 %1585 }
 0x24d   : > { %v1703_v31 = vmul.f32 %v3700_v40, %v1586_v7 }
 0x24f   : > { %v1631_v55 = vpop.xlane.xlu1 %1630 }
 0x250   : > { %v1640_v15 = vpop.xlane.xlu0 %1639  ;;  %v1738_v50 = vmul.f32 %v3705_v22, %v1631_v55  ;;  %v1972_v55 = vpop.f32.mrb[21].mxu1 }
 0x251   : > { %v1741_v0 = vmul.f32 %v3705_v22, %v1640_v15  ;;  %v1973_v1 = vadd.f32 %v3689_v34, %v1972_v55 }
 0x253   : > { %v1583_v45 = vpop.xlane.xlu1 %1582  ;;  %2035 = vst.msk [vmem:[%s3697_s28 + $0x20] sm:$0xff] %vm1532_vm12, %v1973_v1 }
 0x254   : > { %v1592_v20 = vpop.xlane.xlu0 %1591  ;;  %v1702_v11 = vmul.f32 %v3700_v40, %v1583_v45 }
 0x255   : > { %v1705_v39 = vmul.f32 %v3700_v40, %v1592_v20 }
 0x257   : > { %v1637_v29 = vpop.xlane.xlu1 %1636 }
 0x258   : > { %v1535_v52 = vpop.xlane.xlu0 %1534  ;;  %v1740_v32 = vmul.f32 %v3705_v22, %v1637_v29 }
 0x259   : > { %v1682_v2 = vmul.f32 %v3691_v38, %v1535_v52 }
 0x25b   : > { %v1718_v33 = vadd.f32 %v1702_v11, %v1682_v2  ;;  %v1589_v48 = vpop.xlane.xlu1 %1588 }
 0x25c   : > { %v1646_v6 = vpop.xlane.xlu0 %1645  ;;  %v1704_v58 = vmul.f32 %v3700_v40, %v1589_v48 }
 0x25d   : > { %v1754_v41 = vadd.f32 %v1738_v50, %v1718_v33  ;;  %v1743_v29 = vmul.f32 %v3705_v22, %v1646_v6  ;;  %v2422_v33 = vpop.f32.mrb[22].mxu1 }
 0x25f   : > { %v1777_v36 = vadd.f32 %v3715_v46, %v1754_v41  ;;  %v1538_v3 = vpop.xlane.xlu1 %1537  ;;  %v1988_v41 = vadd.f32 %v2422_v33, %v3689_v34 }
 0x260   : > { %v1683_v53 = vmul.f32 %v3691_v38, %v1538_v3  ;;  %v1598_v49 = vpop.xlane.xlu0 %1597 }
 0x261   : > { %v1793_v54 = vmax.f32 %v1777_v36, 0.0  ;;  %v1707_v35 = vmul.f32 %v3700_v40, %v1598_v49  ;;  %v1982_v36 = vpop.f32.mrb[23].mxu1  ;;  %2038 = vst.msk [vmem:[%s3697_s28 + $0x38] sm:$0xff] %vm1532_vm12, %v1988_v41 }
 0x262   : > { %v1719_v10 = vadd.f32 %v1703_v31, %v1683_v53  ;;  %v1983_v53 = vadd.f32 %v3689_v34, %v1982_v36 }
 0x263   : > { %v1643_v37 = vpop.xlane.xlu1 %1642  ;;  %2063 = vrot.lane.b32.xlu1 %v1793_v54, %s2521_s10 }
 0x264   : > { %v1755_v4 = vadd.f32 %v1739_v47, %v1719_v10  ;;  %v1541_v23 = vpop.xlane.xlu0 %1540  ;;  %v1742_v12 = vmul.f32 %v3705_v22, %v1643_v37  ;;  %2037 = vst.msk [vmem:[%s3697_s28 + $0x30] sm:$0xff] %vm1532_vm12, %v1983_v53 }
 0x265   : > { %v1684_v57 = vmul.f32 %v3691_v38, %v1541_v23 }
 0x266   : > { %v1778_v9 = vadd.f32 %v3715_v46, %v1755_v4 }
 0x267   : > { %v1720_v63 = vadd.f32 %v1704_v58, %v1684_v57  ;;  %v1595_v5 = vpop.xlane.xlu1 %1594 }
 0x268   : > { %v1794_v14 = vmax.f32 %v1778_v9, 0.0  ;;  %v1544_v61 = vpop.xlane.xlu0 %1543  ;;  %v1706_v45 = vmul.f32 %v3700_v40, %v1595_v5  ;;  %v2425_v5 = vpop.f32.mrb[24].mxu1 }
 0x269   : > { %v1756_v19 = vadd.f32 %v1740_v32, %v1720_v63  ;;  %v1685_v59 = vmul.f32 %v3691_v38, %v1544_v61  ;;  %v1998_v61 = vadd.f32 %v2425_v5, %v3689_v34 }
 0x26a   : > { %2065 = vrot.lane.b32.xlu0 %v1794_v14, %s2521_s10 }
 0x26b   : > { %v1779_v18 = vadd.f32 %v3715_v46, %v1756_v19  ;;  %v1721_v44 = vadd.f32 %v1705_v39, %v1685_v59  ;;  %v1649_v51 = vpop.xlane.xlu1 %1648  ;;  %v1992_v39 = vpop.f32.mrb[25].mxu1  ;;  %2040 = vst.msk [vmem:[%s3697_s28 + $0x48] sm:$0xff] %vm1532_vm12, %v1998_v61 }
 0x26c   : > { %v1652_v26 = vpop.xlane.xlu0 %1651  ;;  %v1744_v37 = vmul.f32 %v3705_v22, %v1649_v51 }
 0x26d   : > { %v1795_v13 = vmax.f32 %v1779_v18, 0.0  ;;  %v1757_v16 = vadd.f32 %v1741_v0, %v1721_v44  ;;  %v1745_v23 = vmul.f32 %v3705_v22, %v1652_v26  ;;  %v1993_v0 = vadd.f32 %v3689_v34, %v1992_v39 }
 0x26f   : > { %v1780_v56 = vadd.f32 %v3715_v46, %v1757_v16  ;;  %v1601_v43 = vpop.xlane.xlu1 %1600  ;;  %2067 = vrot.lane.b32.xlu1 %v1795_v13, %s2521_s10  ;;  %2039 = vst.msk [vmem:[%s3697_s28 + $0x40] sm:$0xff] %vm1532_vm12, %v1993_v0  ;;  %v2428_v13 = vpop.f32.mrb[26].mxu1 }
 0x270   : > { %v1604_v7 = vpop.xlane.xlu0 %1603  ;;  %v1708_v28 = vmul.f32 %v3700_v40, %v1601_v43  ;;  %v2008_v43 = vadd.f32 %v2428_v13, %v3689_v34  ;;  %v2002_v42 = vpop.f32.mrb[27].mxu1 }
 0x271   : > { %v1796_v15 = vmax.f32 %v1780_v56, 0.0  ;;  %v1709_v10 = vmul.f32 %v3700_v40, %v1604_v7  ;;  %v2003_v21 = vadd.f32 %v3689_v34, %v2002_v42 }
 0x272   : > { %2042 = vst.msk [vmem:[%s3697_s28 + $0x58] sm:$0xff] %vm1532_vm12, %v2008_v43 }
 0x273   : > { %v1547_v60 = vpop.xlane.xlu1 %1546  ;;  %2069 = vrot.lane.b32.xlu1 %v1796_v15, %s2521_s10  ;;  %2041 = vst.msk [vmem:[%s3697_s28 + $0x50] sm:$0xff] %vm1532_vm12, %v2003_v21 }
 0x274   : > { %v1686_v27 = vmul.f32 %v3691_v38, %v1547_v60  ;;  %v1550_v20 = vpop.xlane.xlu0 %1549 }
 0x275   : > { %v1687_v25 = vmul.f32 %v3691_v38, %v1550_v20 }
 0x276   : > { %v1722_v24 = vadd.f32 %v1706_v45, %v1686_v27 }
 0x277   : > { %v1723_v17 = vadd.f32 %v1707_v35, %v1687_v25  ;;  %v1655_v52 = vpop.xlane.xlu1 %1654 }
 0x278   : > { %v1758_v11 = vadd.f32 %v1742_v12, %v1722_v24  ;;  %v1658_v2 = vpop.xlane.xlu0 %1657  ;;  %v1746_v55 = vmul.f32 %v3705_v22, %v1655_v52 }
 0x279   : > { %v1759_v50 = vadd.f32 %v1743_v29, %v1723_v17  ;;  %v1747_v45 = vmul.f32 %v3705_v22, %v1658_v2 }
 0x27a   : > { %v1781_v48 = vadd.f32 %v3715_v46, %v1758_v11 }
 0x27b   : > { %v1782_v3 = vadd.f32 %v3715_v46, %v1759_v50  ;;  %v1607_v31 = vpop.xlane.xlu1 %1606 }
 0x27c   : > { %v1797_v49 = vmax.f32 %v1781_v48, 0.0  ;;  %v1610_v8 = vpop.xlane.xlu0 %1609  ;;  %v1710_v16 = vmul.f32 %v3700_v40, %v1607_v31 }
 0x27d   : > { %v1798_v6 = vmax.f32 %v1782_v3, 0.0  ;;  %v1711_v15 = vmul.f32 %v3700_v40, %v1610_v8 }
 0x27e   : > { %2071 = vrot.lane.b32.xlu0 %v1797_v49, %s2521_s10 }
 0x27f   : > { %v1553_v54 = vpop.xlane.xlu1 %1552  ;;  %2073 = vrot.lane.b32.xlu1 %v1798_v6, %s2521_s10 }
 0x280   : > { %v1688_v62 = vmul.f32 %v3691_v38, %v1553_v54  ;;  %v1556_v47 = vpop.xlane.xlu0 %1555 }
 0x281   : > { %v1689_v30 = vmul.f32 %v3691_v38, %v1556_v47 }
 0x282   : > { %v1724_v4 = vadd.f32 %v1708_v28, %v1688_v62 }
 0x283   : > { %v1725_v58 = vadd.f32 %v1709_v10, %v1689_v30 }
 0x284   : > { %v1760_v57 = vadd.f32 %v1744_v37, %v1724_v4 }
 0x285   : > { %v1761_v9 = vadd.f32 %v1745_v23, %v1725_v58 }
 0x286   : > { %v1783_v32 = vadd.f32 %v3715_v46, %v1760_v57  ;;  %v1661_v63 = vpop.xlane.xlu1 %1660 }
 0x287   : > { %v1784_v14 = vadd.f32 %v3715_v46, %v1761_v9  ;;  %v1748_v36 = vmul.f32 %v3705_v22, %v1661_v63 }
 0x288   : > { %v1799_v19 = vmax.f32 %v1783_v32, 0.0  ;;  %v1664_v59 = vpop.xlane.xlu0 %1663 }
 0x289   : > { %v1800_v18 = vmax.f32 %v1784_v14, 0.0  ;;  %v1749_v49 = vmul.f32 %v3705_v22, %v1664_v59 }
 0x28a   : > { %v1613_v44 = vpop.xlane.xlu1 %1612  ;;  %2075 = vrot.lane.b32.xlu0 %v1799_v19, %s2521_s10 }
 0x28b   : > { %2077 = vrot.lane.b32.xlu1 %v1800_v18, %s2521_s10  ;;  %v1712_v2 = vmul.f32 %v3700_v40, %v1613_v44 }
 0x28c   : > { %v1616_v51 = vpop.xlane.xlu0 %1615 }
 0x28d   : > { %v1713_v3 = vmul.f32 %v3700_v40, %v1616_v51 }
 0x28e   : > { %v1559_v26 = vpop.xlane.xlu1 %1558 }
 0x28f   : > { %v1690_v56 = vmul.f32 %v3691_v38, %v1559_v26 }
 0x290   : > { %v1562_v7 = vpop.xlane.xlu0 %1561 }
 0x291   : > { %v1726_v1 = vadd.f32 %v1710_v16, %v1690_v56  ;;  %v1691_v60 = vmul.f32 %v3691_v38, %v1562_v7 }
 0x293   : > { %v1762_v27 = vadd.f32 %v1746_v55, %v1726_v1  ;;  %v1727_v20 = vadd.f32 %v1711_v15, %v1691_v60 }
 0x295   : > { %v1785_v35 = vadd.f32 %v3715_v46, %v1762_v27  ;;  %v1763_v25 = vadd.f32 %v1747_v45, %v1727_v20 }
 0x297   : > { %v1801_v12 = vmax.f32 %v1785_v35, 0.0  ;;  %v1786_v24 = vadd.f32 %v3715_v46, %v1763_v25 }
 0x299   : > { %v1802_v29 = vmax.f32 %v1786_v24, 0.0  ;;  %2079 = vrot.lane.b32.xlu0 %v1801_v12, %s2521_s10 }
 0x29a   : > { %v1667_v17 = vpop.xlane.xlu1 %1666 }
 0x29b   : > { %2081 = vrot.lane.b32.xlu1 %v1802_v29, %s2521_s10  ;;  %v1750_v18 = vmul.f32 %v3705_v22, %v1667_v17 }
 0x29c   : > { %v1670_v52 = vpop.xlane.xlu0 %1669 }
 0x29d   : > { %v1751_v51 = vmul.f32 %v3705_v22, %v1670_v52 }
 0x29e   : > { %v1619_v11 = vpop.xlane.xlu1 %1618 }
 0x29f   : > { %v1714_v63 = vmul.f32 %v3700_v40, %v1619_v11 }
 0x2a0   : > { %v1622_v50 = vpop.xlane.xlu0 %1621 }
 0x2a1   : > { %v1715_v19 = vmul.f32 %v3700_v40, %v1622_v50 }
 0x2a2   : > { %v1565_v33 = vpop.xlane.xlu1 %1564 }
 0x2a3   : > { %v1692_v48 = vmul.f32 %v3691_v38, %v1565_v33 }
 0x2a4   : > { %v1568_v41 = vpop.xlane.xlu0 %1567 }
 0x2a5   : > { %v1728_v31 = vadd.f32 %v1712_v2, %v1692_v48  ;;  %v1693_v53 = vmul.f32 %v3691_v38, %v1568_v41 }
 0x2a7   : > { %v1764_v8 = vadd.f32 %v1748_v36, %v1728_v31  ;;  %v1729_v6 = vadd.f32 %v1713_v3, %v1693_v53  ;;  %v2431_v30 = vpop.f32.mrb[28].mxu1 }
 0x2a8   : > { %v2018_v37 = vadd.f32 %v2431_v30, %v3689_v34  ;;  %v2012_v4 = vpop.f32.mrb[29].mxu1 }
 0x2a9   : > { %v1787_v54 = vadd.f32 %v3715_v46, %v1764_v8  ;;  %v1765_v28 = vadd.f32 %v1749_v49, %v1729_v6  ;;  %v2013_v58 = vadd.f32 %v3689_v34, %v2012_v4 }
 0x2aa   : > { %2044 = vst.msk [vmem:[%s3697_s28 + $0x68] sm:$0xff] %vm1532_vm12, %v2018_v37 }
 0x2ab   : > { %v1803_v62 = vmax.f32 %v1787_v54, 0.0  ;;  %v1788_v47 = vadd.f32 %v3715_v46, %v1765_v28  ;;  %2043 = vst.msk [vmem:[%s3697_s28 + $0x60] sm:$0xff] %vm1532_vm12, %v2013_v58 }
 0x2ac   : > { %v2434_v32 = vpop.f32.mrb[30].mxu1 }
 0x2ad   : > { %v1804_v10 = vmax.f32 %v1788_v47, 0.0  ;;  %2083 = vrot.lane.b32.xlu0 %v1803_v62, %s2521_s10  ;;  %v2028_v61 = vadd.f32 %v2434_v32, %v3689_v34  ;;  %v2022_v39 = vpop.f32.mrb[31].mxu1 }
 0x2ae   : > { %v2023_v0 = vadd.f32 %v3689_v34, %v2022_v39 }
 0x2af   : > { %2085 = vrot.lane.b32.xlu1 %v1804_v10, %s2521_s10  ;;  %2046 = vst.msk [vmem:[%s3697_s28 + $0x78] sm:$0xff] %vm1532_vm12, %v2028_v61 }
 0x2b0   : > { %2045 = vst.msk [vmem:[%s3697_s28 + $0x70] sm:$0xff] %vm1532_vm12, %v2023_v0  ;;  %vm2111_vm12 = vcmask 130112  }
 0x2b1   : > { %v1625_v23 = vpop.xlane.xlu1 %1624 }
 0x2b2   : > { %v1628_v57 = vpop.xlane.xlu0 %1627  ;;  %v1716_v34 = vmul.f32 %v3700_v40, %v1625_v23 }
 0x2b3   : > { %v1717_v55 = vmul.f32 %v3700_v40, %v1628_v57 }
 0x2b5   : > { %v1571_v9 = vpop.xlane.xlu1 %1570 }
 0x2b6   : > { %v1694_v5 = vmul.f32 %v3691_v38, %v1571_v9  ;;  %v1574_v14 = vpop.xlane.xlu0 %1573 }
 0x2b7   : > { %v1695_v59 = vmul.f32 %v3691_v38, %v1574_v14 }
 0x2b8   : > { %v1730_v44 = vadd.f32 %v1714_v63, %v1694_v5 }
 0x2b9   : > { %v1731_v26 = vadd.f32 %v1715_v19, %v1695_v59  ;;  %v1577_v13 = vpop.xlane.xlu1 %1576 }
 0x2ba   : > { %v1766_v16 = vadd.f32 %v1750_v18, %v1730_v44  ;;  %v1696_v56 = vmul.f32 %v3691_v38, %v1577_v13  ;;  %v1580_v43 = vpop.xlane.xlu0 %1579 }
 0x2bb   : > { %v1767_v42 = vadd.f32 %v1751_v51, %v1731_v26  ;;  %v1697_v7 = vmul.f32 %v3691_v38, %v1580_v43 }
 0x2bc   : > { %v1789_v21 = vadd.f32 %v3715_v46, %v1766_v16  ;;  %v1732_v45 = vadd.f32 %v1716_v34, %v1696_v56 }
 0x2bd   : > { %v1790_v15 = vadd.f32 %v3715_v46, %v1767_v42  ;;  %v1673_v1 = vpop.xlane.xlu1 %1672  ;;  %v1733_v25 = vadd.f32 %v1717_v55, %v1697_v7 }
 0x2be   : > { %v1805_v60 = vmax.f32 %v1789_v21, 0.0  ;;  %v1752_v27 = vmul.f32 %v3705_v22, %v1673_v1  ;;  %v1676_v20 = vpop.xlane.xlu0 %1675 }
 0x2bf   : > { %v1806_v35 = vmax.f32 %v1790_v15, 0.0  ;;  %v1753_v38 = vmul.f32 %v3705_v22, %v1676_v20 }
 0x2c0   : > { %v1768_v12 = vadd.f32 %v1752_v27, %v1732_v45  ;;  %2087 = vrot.lane.b32.xlu0 %v1805_v60, %s2521_s10 }
 0x2c1   : > { %v1769_v24 = vadd.f32 %v1753_v38, %v1733_v25  ;;  %2089 = vrot.lane.b32.xlu1 %v1806_v35, %s2521_s10 }
 0x2c2   : > { %v1791_v40 = vadd.f32 %v3715_v46, %v1768_v12 }
 0x2c3   : > { %v1792_v29 = vadd.f32 %v3715_v46, %v1769_v24 }
 0x2c4   : > { %v1807_v17 = vmax.f32 %v1791_v40, 0.0 }
 0x2c5   : > { %v1808_v52 = vmax.f32 %v1792_v29, 0.0 }
 0x2c6   : > { %2091 = vrot.lane.b32.xlu0 %v1807_v17, %s2521_s10 }
 0x2c7   : > { %2093 = vrot.lane.b32.xlu1 %v1808_v52, %s2521_s10 }
 0x2d5   : > { %v2064_v22 = vpop.permute.xlu1 %2063 }
 0x2d6   : > { %2112 = vst.msk [vmem:[%s3697_s28] sm:$0xff] %vm2111_vm12, %v2064_v22 }
 0x2dc   : > { %v2066_v11 = vpop.permute.xlu0 %2065 }
 0x2dd   : > { %2113 = vst.msk [vmem:[%s3697_s28 + $0x8] sm:$0xff] %vm2111_vm12, %v2066_v11 }
 0x2e1   : > { %v2068_v50 = vpop.permute.xlu1 %2067 }
 0x2e2   : > { %2114 = vst.msk [vmem:[%s3697_s28 + $0x10] sm:$0xff] %vm2111_vm12, %v2068_v50 }
 0x2e5   : > { %v2070_v46 = vpop.permute.xlu1 %2069 }
 0x2e6   : > { %2115 = vst.msk [vmem:[%s3697_s28 + $0x18] sm:$0xff] %vm2111_vm12, %v2070_v46 }
 0x2f0   : > { %v2072_v33 = vpop.permute.xlu0 %2071 }
 0x2f1   : > { %2116 = vst.msk [vmem:[%s3697_s28 + $0x20] sm:$0xff] %vm2111_vm12, %v2072_v33  ;;  %v2074_v2 = vpop.permute.xlu1 %2073 }
 0x2f2   : > { %2117 = vst.msk [vmem:[%s3697_s28 + $0x28] sm:$0xff] %vm2111_vm12, %v2074_v2 }
 0x2fc   : > { %v2076_v48 = vpop.permute.xlu0 %2075 }
 0x2fd   : > { %2118 = vst.msk [vmem:[%s3697_s28 + $0x30] sm:$0xff] %vm2111_vm12, %v2076_v48  ;;  %v2078_v41 = vpop.permute.xlu1 %2077 }
 0x2fe   : > { %2119 = vst.msk [vmem:[%s3697_s28 + $0x38] sm:$0xff] %vm2111_vm12, %v2078_v41 }
 0x30b   : > { %v2080_v36 = vpop.permute.xlu0 %2079 }
 0x30c   : > { %2120 = vst.msk [vmem:[%s3697_s28 + $0x40] sm:$0xff] %vm2111_vm12, %v2080_v36 }
 0x30d   : > { %v2082_v3 = vpop.permute.xlu1 %2081 }
 0x30e   : > { %2121 = vst.msk [vmem:[%s3697_s28 + $0x48] sm:$0xff] %vm2111_vm12, %v2082_v3 }
 0x31f   : > { %v2084_v31 = vpop.permute.xlu0 %2083 }
 0x320   : > { %2122 = vst.msk [vmem:[%s3697_s28 + $0x50] sm:$0xff] %vm2111_vm12, %v2084_v31 }
 0x321   : > { %v2086_v53 = vpop.permute.xlu1 %2085 }
 0x322   : > { %2123 = vst.msk [vmem:[%s3697_s28 + $0x58] sm:$0xff] %vm2111_vm12, %v2086_v53 }
 0x332   : > { %v2088_v49 = vpop.permute.xlu0 %2087 }
 0x333   : > { %2124 = vst.msk [vmem:[%s3697_s28 + $0x60] sm:$0xff] %vm2111_vm12, %v2088_v49  ;;  %v2090_v8 = vpop.permute.xlu1 %2089 }
 0x334   : > { %2125 = vst.msk [vmem:[%s3697_s28 + $0x68] sm:$0xff] %vm2111_vm12, %v2090_v8 }
 0x338   : > { %v2092_v6 = vpop.permute.xlu0 %2091 }
 0x339   : > { %2126 = vst.msk [vmem:[%s3697_s28 + $0x70] sm:$0xff] %vm2111_vm12, %v2092_v6  ;;  %v2094_v54 = vpop.permute.xlu1 %2093 }
 0x33a   : > { %2127 = vst.msk [vmem:[%s3697_s28 + $0x78] sm:$0xff] %vm2111_vm12, %v2094_v54 }
 0x33b PF: > { %s19_s30 = sadd.s32 1, %s2514_s30  }
 0x33c   : > { %p16_p5 = scmp.ge.s32.totalorder %s19_s30, 5  }
 0x33e   :  { %18 = sbr.rel (!%p16_p5) target bundleno = 1 (0x1), region = 95 }

</bundles_post_ra>
